<compile_context>
chip_gen: v7x
topology: tpu7x:2x2x1
jax: 0.10.0
libtpu: 0.0.40
codegen_flags: <defaults>
</compile_context>

<pallas_src>
import math

import numpy as np
import jax
import jax.numpy as jnp
from jax.experimental import pallas as pl
from jax.experimental.pallas import tpu as pltpu

HIDDEN = 32
HEADS = 4
HEAD_DIM = HIDDEN // HEADS
NUM_LAYERS = 2
NEG_INF = -1e30
SLAB_LANES = 128  # lane width of the packed weight / bias slabs


# ----------------------------------------------------------- layout helpers ----

def _src_groups(node_types, edge_types):
    return {nt: [et for et in edge_types if et[0] == nt] for nt in node_types}


def _make_layout(node_types, edge_types):
    """Deterministic row layout of the packed weight/bias slabs (host & kernel)."""
    w_blocks, b_rows = [], []
    for nt in node_types:
        w_blocks.append(("enc", nt))
        b_rows.append(("enc", nt))
    for l in range(NUM_LAYERS):
        for nt in node_types:
            w_blocks.append(("q", l, nt))
            b_rows.append(("q", l, nt))
        for nt in node_types:
            w_blocks.append(("kv", l, nt))
            b_rows.append(("kv", l, nt))
        for nt in node_types:
            w_blocks.append(("a", l, nt))
            b_rows.append(("a", l, nt))
    for name in ("w1a", "w1b", "w2"):
        w_blocks.append((name,))
    b_rows += [("b1",), ("b2",)]
    w_idx = {k: i for i, k in enumerate(w_blocks)}
    b_idx = {k: i for i, k in enumerate(b_rows)}
    return w_idx, b_idx, len(w_blocks), len(b_rows)


# ------------------------------------------------------------ fused kernel ----

def make_hgt_kernel(node_types, edge_types, num_nodes, n_pairs, n_pairs_pad):
    w_idx, b_idx, _, _ = _make_layout(node_types, edge_types)
    groups = _src_groups(node_types, edge_types)
    n_nt = len(node_types)

    node_off, off = {}, 0
    for nt in node_types:
        node_off[nt] = off
        off += num_nodes[nt]

    slot_off, off = {}, 0
    for et in edge_types:
        slot_off[et] = off
        off += num_nodes[et[0]]
    n_slots = off
    big = HEADS * n_slots

    def kernel(x_ref, w_ref, b_ref, attn_ref, sel_ref, alpha_ref, o_ref):
        # ---- static slab accessors (free views into VMEM-resident slabs) -------
        def wblk(key, width):
            r = w_idx[key] * HIDDEN
            return w_ref[r:r + HIDDEN, 0:width]

        def brow(key, width):
            r = b_idx[key]
            return b_ref[r:r + 1, 0:width]

        def affine(a, key, width):
            return jnp.dot(a, wblk(key, width),
                           preferred_element_type=jnp.float32) + brow(key, width)

        def rows(arr, nt):
            return arr[node_off[nt]:node_off[nt] + num_nodes[nt], :]

        # Per-head lane mask [HEADS*n_slots, HIDDEN]: block h keeps only head h's
        # 8 output lanes.  It also doubles as the softmax-denominator indicator.
        col = jax.lax.broadcasted_iota(jnp.int32, (n_slots, HIDDEN), 1)
        lane_mask = jnp.concatenate(
            [((col >= h * HEAD_DIM) & (col < (h + 1) * HEAD_DIM)).astype(jnp.float32)
             for h in range(HEADS)], axis=0)

        mask_bias = attn_ref[:, 0:big]          # additive 0 / NEG_INF, head-tiled
        has_edge = attn_ref[:, big:big + 1]     # 1.0 iff node has >= 1 incoming edge

        # ---- 1) per-node-type encoders -> one stacked [n_total, HIDDEN] slab ----
        h_all = jnp.concatenate(
            [affine(rows(x_ref, nt), ("enc", nt), HIDDEN) for nt in node_types],
            axis=0)

        # ---- 2) HGT layers, fully VMEM/vreg resident -----------------------------
        for l in range(NUM_LAYERS):
            # Q per destination type (1/sqrt(d) scale folded into the weights).
            q_all = jnp.concatenate(
                [affine(rows(h_all, nt), ("q", l, nt), HIDDEN) for nt in node_types],
                axis=0)

            # One fused K|V projection per *source* type; per-edge-type relation
            # transforms a_rel/m_rel and the prior p_rel are pre-folded on the host.
            k_parts, v_parts = {}, {}
            for nt in node_types:
                ets = groups[nt]
                if not ets:
                    continue
                width = 2 * HIDDEN * len(ets)
                kv = affine(rows(h_all, nt), ("kv", l, nt), width)
                for j, et in enumerate(ets):
                    k_parts[et] = kv[:, j * HIDDEN:(j + 1) * HIDDEN]
                    v_parts[et] = kv[:, (len(ets) + j) * HIDDEN:(len(ets) + j + 1) * HIDDEN]

            k_cat = jnp.concatenate([k_parts[et] for et in edge_types], axis=0)
            v_cat = jnp.concatenate([v_parts[et] for et in edge_types], axis=0)

            # Head-batched attention over ALL destination node types at once:
            # row-tile K/V per head (aligned row concat), mask each copy to its
            # 8 lanes, then one score + one value + one denominator matmul cover
            # every (head, edge type, destination type) combination.
            k_big = jnp.concatenate([k_cat] * HEADS, axis=0) * lane_mask
            v_big = jnp.concatenate([v_cat] * HEADS, axis=0) * lane_mask

            s = jax.lax.dot_general(q_all, k_big, (((1,), (1,)), ((), ())),
                                    preferred_element_type=jnp.float32)
            s = s + mask_bias
            e = jnp.exp(s - jnp.max(s, axis=1, keepdims=True))
            num = jnp.dot(e, v_big, preferred_element_type=jnp.float32)
            den = jnp.dot(e, lane_mask, preferred_element_type=jnp.float32)
            agg = num * pl.reciprocal(jnp.maximum(den, 1e-30), approx=True) * has_edge

            # a_lin(gelu(.)), sigmoid-gated skip blend, top-level ReLU, per type.
            # TODO(synk): tanh-approx GELU per perf review; PyTorch uses exact erf.
            g = jax.nn.gelu(agg, approximate=True)
            new_parts = []
            for ti, nt in enumerate(node_types):
                y = affine(rows(g, nt), ("a", l, nt), HIDDEN)
                alpha = alpha_ref[l * n_nt + ti]
                new_parts.append(
                    jnp.maximum(alpha * y + (1.0 - alpha) * rows(h_all, nt), 0.0))
            h_all = jnp.concatenate(new_parts, axis=0)

        # ---- 3) correlation head over node pairs (one-hot gather matmul) --------
        emb = jnp.dot(sel_ref[...], h_all, preferred_element_type=jnp.float32)
        emb1 = emb[0:n_pairs_pad, :]
        emb2 = emb[n_pairs_pad:2 * n_pairs_pad, :]
        hid = (jnp.dot(emb1, wblk(("w1a",), HIDDEN), preferred_element_type=jnp.float32)
               + jnp.dot(emb2, wblk(("w1b",), HIDDEN), preferred_element_type=jnp.float32)
               + brow(("b1",), HIDDEN))
        hid = jnp.maximum(hid, 0.0)
        out = jax.nn.sigmoid(
            jnp.dot(hid, wblk(("w2",), 1), preferred_element_type=jnp.float32)
            + brow(("b2",), 1))
        o_ref[...] = out[0:n_pairs, :]

    return kernel


# --------------------------------------------------------------- wrapper ----

def _block_diag(blocks):
    """blocks: [HEADS, HEAD_DIM, HEAD_DIM] -> [HIDDEN, HIDDEN] block-diagonal."""
    out = np.zeros((HIDDEN, HIDDEN), np.float32)
    for h in range(HEADS):
        sl = slice(h * HEAD_DIM, (h + 1) * HEAD_DIM)
        out[sl, sl] = blocks[h]
    return out


def hgt_forward(params, x_dict, adj_dict, node_pairs, node_types, edge_types):
    if not node_pairs:
        return jnp.zeros((0, 1), jnp.float32)

    num_nodes = {nt: int(x_dict[nt].shape[0]) for nt in node_types}
    groups = _src_groups(node_types, edge_types)
    w_idx, b_idx, n_wblk, n_brow = _make_layout(node_types, edge_types)
    scale = 1.0 / math.sqrt(HEAD_DIM)

    node_off, off = {}, 0
    for nt in node_types:
        node_off[nt] = off
        off += num_nodes[nt]
    n_total = off
    slot_off, off = {}, 0
    for et in edge_types:
        slot_off[et] = off
        off += num_nodes[et[0]]
    n_slots = off
    big = HEADS * n_slots

    # ---- feature slab: all node features stacked, zero-padded to HIDDEN lanes --
    # TODO(synk): encoder fan-in > HIDDEN would need a wider feature slab and
    # multi-block encoder weights.
    x_slab = np.zeros((n_total, HIDDEN), np.float32)
    for nt in node_types:
        f = np.asarray(x_dict[nt], np.float32)
        x_slab[node_off[nt]:node_off[nt] + num_nodes[nt], :f.shape[1]] = f

    # ---- weight / bias slabs: one DMA each instead of ~40 tiny operand DMAs ----
    w_slab = np.zeros((n_wblk * HIDDEN, SLAB_LANES), np.float32)
    b_slab = np.zeros((n_brow, SLAB_LANES), np.float32)

    def put_w(key, w):
        w = np.asarray(w, np.float32)
        r = w_idx[key] * HIDDEN
        w_slab[r:r + w.shape[0], :w.shape[1]] = w

    def put_b(key, b):
        b = np.asarray(b, np.float32).reshape(-1)
        b_slab[b_idx[key], :b.shape[0]] = b

    for nt in node_types:
        put_w(("enc", nt), params["enc"][nt]["w"])
        put_b(("enc", nt), params["enc"][nt]["b"])

    alphas = []
    for l, lp in enumerate(params["layers"]):
        for nt in node_types:
            put_w(("q", l, nt), np.asarray(lp["q"][nt]["w"], np.float32) * scale)
            put_b(("q", l, nt), np.asarray(lp["q"][nt]["b"], np.float32) * scale)
            put_w(("a", l, nt), lp["a_lin"][nt]["w"])
            put_b(("a", l, nt), lp["a_lin"][nt]["b"])
            alphas.append(float(jax.nn.sigmoid(lp["skip"][nt])[0]))
        for nt in node_types:
            ets = groups[nt]
            if not ets:
                continue
            kw, vw, kb, vb = [], [], [], []
            for et in ets:
                rel = lp["rel"][et]
                # Fold the prior p_rel and per-head relation transforms into the
                # K/V projections (exact):  (x@Wk + bk)@blkdiag(p*a) == x@(Wk@A)+bk@A
                a_blk = _block_diag(np.asarray(rel["a"], np.float32)
                                    * np.asarray(rel["p"], np.float32)[:, None, None])
                m_blk = _block_diag(np.asarray(rel["m"], np.float32))
                kw.append(np.asarray(lp["k"][nt]["w"], np.float32) @ a_blk)
                kb.append(np.asarray(lp["k"][nt]["b"], np.float32) @ a_blk)
                vw.append(np.asarray(lp["v"][nt]["w"], np.float32) @ m_blk)
                vb.append(np.asarray(lp["v"][nt]["b"], np.float32) @ m_blk)
            put_w(("kv", l, nt), np.concatenate(kw + vw, axis=1))
            put_b(("kv", l, nt), np.concatenate(kb + vb, axis=1).reshape(-1))

    cw1 = np.asarray(params["corr"]["w1"], np.float32)      # [2*HIDDEN, HIDDEN]
    put_w(("w1a",), cw1[:HIDDEN, :])
    put_w(("w1b",), cw1[HIDDEN:, :])
    put_w(("w2",), params["corr"]["w2"])
    put_b(("b1",), params["corr"]["b1"])
    put_b(("b2",), params["corr"]["b2"])

    # ---- attention slab: head-tiled additive mask + has_edge flag --------------
    mb = np.full((n_total, n_slots), NEG_INF, np.float32)
    for et in edge_types:
        src, _, dst = et
        adj = np.asarray(adj_dict[et], np.float32)           # [n_dst, n_src]
        r0, c0 = node_off[dst], slot_off[et]
        mb[r0:r0 + num_nodes[dst], c0:c0 + num_nodes[src]] = \
            np.where(adj > 0.0, 0.0, NEG_INF)
    attn_width = ((big + 1 + 127) // 128) * 128
    attn = np.zeros((n_total, attn_width), np.float32)
    attn[:, :big] = np.tile(mb, (1, HEADS))
    attn[:, big] = (mb > 0.5 * NEG_INF).any(axis=1).astype(np.float32)

    # ---- pair-selection slab: sel1 | sel2 packed, rows padded to a sublane tile -
    P = len(node_pairs)
    Pp = ((P + 7) // 8) * 8
    sel = np.zeros((2 * Pp, n_total), np.float32)
    for p, ((t1, i1), (t2, i2)) in enumerate(node_pairs):
        sel[p, node_off[t1] + i1] = 1.0
        sel[Pp + p, node_off[t2] + i2] = 1.0

    kernel = make_hgt_kernel(node_types, edge_types, num_nodes, P, Pp)
    vmem = pl.BlockSpec(memory_space=pltpu.MemorySpace.VMEM)
    smem = pl.BlockSpec(memory_space=pltpu.MemorySpace.SMEM)

    # TODO(synk): beyond a few thousand nodes the dense [n_total, HEADS*n_slots]
    # mask no longer fits VMEM; add a grid over destination-node blocks with
    # dimension_semantics=("parallel", "arbitrary"), halve the dst tile for v7x's
    # 64 MiB/TC VMEM, and cast weights/K/V to bf16 on v6e/v7x.
    return pl.pallas_call(
        kernel,
        out_shape=jax.ShapeDtypeStruct((P, 1), jnp.float32),
        in_specs=[vmem] * 5 + [smem],
        out_specs=vmem,
        compiler_params=pltpu.CompilerParams(vmem_limit_bytes=32 * 1024 * 1024),
    )(jnp.asarray(x_slab), jnp.asarray(w_slab), jnp.asarray(b_slab),
      jnp.asarray(attn), jnp.asarray(sel),
      jnp.asarray(np.asarray(alphas, np.float32)))


# ------------------------------------------------------------ model setup ----

class KeyGen:
    def __init__(self, key):
        self.key = key

    def __call__(self):
        self.key, sub = jax.random.split(self.key)
        return sub


def init_params(key, node_types, edge_types, in_dims):
    kg = KeyGen(key)

    def lin(fan_in, fan_out):
        s = 1.0 / math.sqrt(fan_in)
        return {"w": jax.random.uniform(kg(), (fan_in, fan_out), jnp.float32, -s, s),
                "b": jax.random.uniform(kg(), (1, fan_out), jnp.float32, -s, s)}

    params = {"enc": {nt: lin(in_dims[nt], HIDDEN) for nt in node_types}}
    layers = []
    for _ in range(NUM_LAYERS):
        layers.append({
            "k": {nt: lin(HIDDEN, HIDDEN) for nt in node_types},
            "q": {nt: lin(HIDDEN, HIDDEN) for nt in node_types},
            "v": {nt: lin(HIDDEN, HIDDEN) for nt in node_types},
            "a_lin": {nt: lin(HIDDEN, HIDDEN) for nt in node_types},
            "skip": {nt: jnp.ones((1,), jnp.float32) for nt in node_types},
            "rel": {
                et: {
                    "a": 0.1 * jax.random.normal(kg(), (HEADS, HEAD_DIM, HEAD_DIM), jnp.float32),
                    "m": 0.1 * jax.random.normal(kg(), (HEADS, HEAD_DIM, HEAD_DIM), jnp.float32),
                    "p": jnp.ones((HEADS,), jnp.float32),
                }
                for et in edge_types
            },
        })
    params["layers"] = layers
    l1, l2 = lin(2 * HIDDEN, HIDDEN), lin(HIDDEN, 1)
    params["corr"] = {"w1": l1["w"], "b1": l1["b"], "w2": l2["w"], "b2": l2["b"]}
    return params


def build_adj(key, n_dst, n_src, n_edges):
    k1, k2 = jax.random.split(key)
    dst = jax.random.randint(k1, (n_edges,), 0, n_dst)
    src = jax.random.randint(k2, (n_edges,), 0, n_src)
    return jnp.zeros((n_dst, n_src), jnp.float32).at[dst, src].set(1.0)


if __name__ == "__main__":
    node_types = ["service", "host"]
    edge_types = [
        ("service", "calls", "service"),
        ("service", "runs_on", "host"),
        ("host", "hosts", "service"),
    ]
    num_nodes = {"service": 16, "host": 16}
    in_dims = {"service": 12, "host": 20}

    root = jax.random.PRNGKey(0)
    k_param, k_feat, k_edge = jax.random.split(root, 3)

    params = init_params(k_param, node_types, edge_types, in_dims)

    feat_keys = jax.random.split(k_feat, len(node_types))
    x_dict = {
        nt: jax.random.normal(fk, (num_nodes[nt], in_dims[nt]), jnp.float32)
        for nt, fk in zip(node_types, feat_keys)
    }

    edge_keys = jax.random.split(k_edge, len(edge_types))
    adj_dict = {
        et: build_adj(ek, num_nodes[et[2]], num_nodes[et[0]], 24)
        for et, ek in zip(edge_types, edge_keys)
    }

    node_pairs = [
        (("service", 0), ("host", 1)),
        (("service", 3), ("service", 5)),
        (("host", 2), ("host", 7)),
        (("service", 8), ("host", 4)),
    ]

    # TODO(synk): dropout layers are treated as identity (eval mode).
    out = hgt_forward(params, x_dict, adj_dict, node_pairs, node_types, edge_types)
    out = jax.block_until_ready(out)

    assert out.shape == (len(node_pairs), 1)
    assert bool(jnp.all(jnp.isfinite(out)))
    assert bool(jnp.all((out >= 0.0) & (out <= 1.0)))
    print("KERNEL_OK")
</pallas_src>

<mosaic_0001>
module attributes {stable_mosaic.version = 11 : i64} {
  func.func @kernel(%arg0: memref<32x32xf32, #tpu.memory_space<vmem>>, %arg1: memref<544x128xf32, #tpu.memory_space<vmem>>, %arg2: memref<16x128xf32, #tpu.memory_space<vmem>>, %arg3: memref<32x256xf32, #tpu.memory_space<vmem>>, %arg4: memref<16x32xf32, #tpu.memory_space<vmem>>, %arg5: memref<4xf32, #tpu.memory_space<smem>>, %arg6: memref<4x1xf32, #tpu.memory_space<vmem>>) attributes {dimension_semantics = [], scalar_prefetch = 0 : i64, scratch_operands = 0 : i64, tpu.core_type = #tpu.core_type<tc>} {
    %0 = tpu.iota {dimensions = array<i32: 1>} : vector<48x32xi32>
    %c0_i32 = arith.constant 0 : i32
    %1 = vector.broadcast %c0_i32 : i32 to vector<48x32xi32>
    %2 = arith.cmpi sge, %0, %1 : vector<48x32xi32>
    %c8_i32 = arith.constant 8 : i32
    %3 = vector.broadcast %c8_i32 : i32 to vector<48x32xi32>
    %4 = arith.cmpi slt, %0, %3 : vector<48x32xi32>
    %5 = arith.andi %2, %4 : vector<48x32xi1>
    %6 = arith.extui %5 : vector<48x32xi1> to vector<48x32xi32>
    %7 = arith.sitofp %6 : vector<48x32xi32> to vector<48x32xf32>
    %c8_i32_0 = arith.constant 8 : i32
    %8 = vector.broadcast %c8_i32_0 : i32 to vector<48x32xi32>
    %9 = arith.cmpi sge, %0, %8 : vector<48x32xi32>
    %c16_i32 = arith.constant 16 : i32
    %10 = vector.broadcast %c16_i32 : i32 to vector<48x32xi32>
    %11 = arith.cmpi slt, %0, %10 : vector<48x32xi32>
    %12 = arith.andi %9, %11 : vector<48x32xi1>
    %13 = arith.extui %12 : vector<48x32xi1> to vector<48x32xi32>
    %14 = arith.sitofp %13 : vector<48x32xi32> to vector<48x32xf32>
    %c16_i32_1 = arith.constant 16 : i32
    %15 = vector.broadcast %c16_i32_1 : i32 to vector<48x32xi32>
    %16 = arith.cmpi sge, %0, %15 : vector<48x32xi32>
    %c24_i32 = arith.constant 24 : i32
    %17 = vector.broadcast %c24_i32 : i32 to vector<48x32xi32>
    %18 = arith.cmpi slt, %0, %17 : vector<48x32xi32>
    %19 = arith.andi %16, %18 : vector<48x32xi1>
    %20 = arith.extui %19 : vector<48x32xi1> to vector<48x32xi32>
    %21 = arith.sitofp %20 : vector<48x32xi32> to vector<48x32xf32>
    %c24_i32_2 = arith.constant 24 : i32
    %22 = vector.broadcast %c24_i32_2 : i32 to vector<48x32xi32>
    %23 = arith.cmpi sge, %0, %22 : vector<48x32xi32>
    %c32_i32 = arith.constant 32 : i32
    %24 = vector.broadcast %c32_i32 : i32 to vector<48x32xi32>
    %25 = arith.cmpi slt, %0, %24 : vector<48x32xi32>
    %26 = arith.andi %23, %25 : vector<48x32xi1>
    %27 = arith.extui %26 : vector<48x32xi1> to vector<48x32xi32>
    %28 = arith.sitofp %27 : vector<48x32xi32> to vector<48x32xf32>
    %29 = tpu.concatenate %7, %14, %21, %28 in 0 : vector<48x32xf32>, vector<48x32xf32>, vector<48x32xf32>, vector<48x32xf32> -> vector<192x32xf32>
    %c0 = arith.constant 0 : index
    %c0_3 = arith.constant 0 : index
    %30 = vector.load %arg3[%c0, %c0_3] : memref<32x256xf32, #tpu.memory_space<vmem>>, vector<32x192xf32>
    %c0_4 = arith.constant 0 : index
    %c192 = arith.constant 192 : index
    %31 = vector.load %arg3[%c0_4, %c192] : memref<32x256xf32, #tpu.memory_space<vmem>>, vector<32x1xf32>
    %c0_5 = arith.constant 0 : index
    %c0_6 = arith.constant 0 : index
    %32 = vector.load %arg0[%c0_5, %c0_6] : memref<32x32xf32, #tpu.memory_space<vmem>>, vector<16x32xf32>
    %c0_7 = arith.constant 0 : index
    %c0_8 = arith.constant 0 : index
    %33 = vector.load %arg1[%c0_7, %c0_8] : memref<544x128xf32, #tpu.memory_space<vmem>>, vector<32x32xf32>
    %cst = arith.constant dense<0.000000e+00> : vector<16x32xf32>
    %34 = tpu.matmul %32, %33, %cst {dimension_numbers = #tpu.dot_dimension_numbers<[1], [0], [0], [1], [0, 0, 1, 1], [], []>} : vector<16x32xf32>, vector<32x32xf32>, vector<16x32xf32> -> vector<16x32xf32>
    %c0_9 = arith.constant 0 : index
    %c0_10 = arith.constant 0 : index
    %35 = vector.load %arg2[%c0_9, %c0_10] : memref<16x128xf32, #tpu.memory_space<vmem>>, vector<1x32xf32>
    %36 = vector.broadcast %35 : vector<1x32xf32> to vector<16x32xf32>
    %37 = arith.addf %34, %36 : vector<16x32xf32>
    %c16 = arith.constant 16 : index
    %c0_11 = arith.constant 0 : index
    %38 = vector.load %arg0[%c16, %c0_11] : memref<32x32xf32, #tpu.memory_space<vmem>>, vector<16x32xf32>
    %c32 = arith.constant 32 : index
    %c0_12 = arith.constant 0 : index
    %39 = vector.load %arg1[%c32, %c0_12] : memref<544x128xf32, #tpu.memory_space<vmem>>, vector<32x32xf32>
    %cst_13 = arith.constant dense<0.000000e+00> : vector<16x32xf32>
    %40 = tpu.matmul %38, %39, %cst_13 {dimension_numbers = #tpu.dot_dimension_numbers<[1], [0], [0], [1], [0, 0, 1, 1], [], []>} : vector<16x32xf32>, vector<32x32xf32>, vector<16x32xf32> -> vector<16x32xf32>
    %c1 = arith.constant 1 : index
    %c0_14 = arith.constant 0 : index
    %41 = vector.load %arg2[%c1, %c0_14] : memref<16x128xf32, #tpu.memory_space<vmem>>, vector<1x32xf32>
    %42 = vector.broadcast %41 : vector<1x32xf32> to vector<16x32xf32>
    %43 = arith.addf %40, %42 : vector<16x32xf32>
    %44 = tpu.concatenate %37, %43 in 0 : vector<16x32xf32>, vector<16x32xf32> -> vector<32x32xf32>
    %45 = vector.extract_strided_slice %44 {offsets = [0, 0], sizes = [16, 32], strides = [1, 1]} : vector<32x32xf32> to vector<16x32xf32>
    %c64 = arith.constant 64 : index
    %c0_15 = arith.constant 0 : index
    %46 = vector.load %arg1[%c64, %c0_15] : memref<544x128xf32, #tpu.memory_space<vmem>>, vector<32x32xf32>
    %cst_16 = arith.constant dense<0.000000e+00> : vector<16x32xf32>
    %47 = tpu.matmul %45, %46, %cst_16 {dimension_numbers = #tpu.dot_dimension_numbers<[1], [0], [0], [1], [0, 0, 1, 1], [], []>} : vector<16x32xf32>, vector<32x32xf32>, vector<16x32xf32> -> vector<16x32xf32>
    %c2 = arith.constant 2 : index
    %c0_17 = arith.constant 0 : index
    %48 = vector.load %arg2[%c2, %c0_17] : memref<16x128xf32, #tpu.memory_space<vmem>>, vector<1x32xf32>
    %49 = vector.broadcast %48 : vector<1x32xf32> to vector<16x32xf32>
    %50 = arith.addf %47, %49 : vector<16x32xf32>
    %51 = vector.extract_strided_slice %44 {offsets = [16, 0], sizes = [16, 32], strides = [1, 1]} : vector<32x32xf32> to vector<16x32xf32>
    %c96 = arith.constant 96 : index
    %c0_18 = arith.constant 0 : index
    %52 = vector.load %arg1[%c96, %c0_18] : memref<544x128xf32, #tpu.memory_space<vmem>>, vector<32x32xf32>
    %cst_19 = arith.constant dense<0.000000e+00> : vector<16x32xf32>
    %53 = tpu.matmul %51, %52, %cst_19 {dimension_numbers = #tpu.dot_dimension_numbers<[1], [0], [0], [1], [0, 0, 1, 1], [], []>} : vector<16x32xf32>, vector<32x32xf32>, vector<16x32xf32> -> vector<16x32xf32>
    %c3 = arith.constant 3 : index
    %c0_20 = arith.constant 0 : index
    %54 = vector.load %arg2[%c3, %c0_20] : memref<16x128xf32, #tpu.memory_space<vmem>>, vector<1x32xf32>
    %55 = vector.broadcast %54 : vector<1x32xf32> to vector<16x32xf32>
    %56 = arith.addf %53, %55 : vector<16x32xf32>
    %57 = tpu.concatenate %50, %56 in 0 : vector<16x32xf32>, vector<16x32xf32> -> vector<32x32xf32>
    %58 = vector.extract_strided_slice %44 {offsets = [0, 0], sizes = [16, 32], strides = [1, 1]} : vector<32x32xf32> to vector<16x32xf32>
    %c128 = arith.constant 128 : index
    %c0_21 = arith.constant 0 : index
    %59 = vector.load %arg1[%c128, %c0_21] : memref<544x128xf32, #tpu.memory_space<vmem>>, vector<32x128xf32>
    %cst_22 = arith.constant dense<0.000000e+00> : vector<16x128xf32>
    %60 = tpu.matmul %58, %59, %cst_22 {dimension_numbers = #tpu.dot_dimension_numbers<[1], [0], [0], [1], [0, 0, 1, 1], [], []>} : vector<16x32xf32>, vector<32x128xf32>, vector<16x128xf32> -> vector<16x128xf32>
    %c4 = arith.constant 4 : index
    %c0_23 = arith.constant 0 : index
    %61 = vector.load %arg2[%c4, %c0_23] : memref<16x128xf32, #tpu.memory_space<vmem>>, vector<1x128xf32>
    %62 = vector.broadcast %61 : vector<1x128xf32> to vector<16x128xf32>
    %63 = arith.addf %60, %62 : vector<16x128xf32>
    %64 = vector.extract_strided_slice %63 {offsets = [0, 0], sizes = [16, 32], strides = [1, 1]} : vector<16x128xf32> to vector<16x32xf32>
    %65 = vector.extract_strided_slice %63 {offsets = [0, 64], sizes = [16, 32], strides = [1, 1]} : vector<16x128xf32> to vector<16x32xf32>
    %66 = vector.extract_strided_slice %63 {offsets = [0, 32], sizes = [16, 32], strides = [1, 1]} : vector<16x128xf32> to vector<16x32xf32>
    %67 = vector.extract_strided_slice %63 {offsets = [0, 96], sizes = [16, 32], strides = [1, 1]} : vector<16x128xf32> to vector<16x32xf32>
    %68 = vector.extract_strided_slice %44 {offsets = [16, 0], sizes = [16, 32], strides = [1, 1]} : vector<32x32xf32> to vector<16x32xf32>
    %c160 = arith.constant 160 : index
    %c0_24 = arith.constant 0 : index
    %69 = vector.load %arg1[%c160, %c0_24] : memref<544x128xf32, #tpu.memory_space<vmem>>, vector<32x64xf32>
    %cst_25 = arith.constant dense<0.000000e+00> : vector<16x64xf32>
    %70 = tpu.matmul %68, %69, %cst_25 {dimension_numbers = #tpu.dot_dimension_numbers<[1], [0], [0], [1], [0, 0, 1, 1], [], []>} : vector<16x32xf32>, vector<32x64xf32>, vector<16x64xf32> -> vector<16x64xf32>
    %c5 = arith.constant 5 : index
    %c0_26 = arith.constant 0 : index
    %71 = vector.load %arg2[%c5, %c0_26] : memref<16x128xf32, #tpu.memory_space<vmem>>, vector<1x64xf32>
    %72 = vector.broadcast %71 : vector<1x64xf32> to vector<16x64xf32>
    %73 = arith.addf %70, %72 : vector<16x64xf32>
    %74 = vector.extract_strided_slice %73 {offsets = [0, 0], sizes = [16, 32], strides = [1, 1]} : vector<16x64xf32> to vector<16x32xf32>
    %75 = vector.extract_strided_slice %73 {offsets = [0, 32], sizes = [16, 32], strides = [1, 1]} : vector<16x64xf32> to vector<16x32xf32>
    %76 = tpu.concatenate %64, %66, %74 in 0 : vector<16x32xf32>, vector<16x32xf32>, vector<16x32xf32> -> vector<48x32xf32>
    %77 = tpu.concatenate %65, %67, %75 in 0 : vector<16x32xf32>, vector<16x32xf32>, vector<16x32xf32> -> vector<48x32xf32>
    %78 = tpu.concatenate %76, %76, %76, %76 in 0 : vector<48x32xf32>, vector<48x32xf32>, vector<48x32xf32>, vector<48x32xf32> -> vector<192x32xf32>
    %79 = arith.mulf %78, %29 : vector<192x32xf32>
    %80 = tpu.concatenate %77, %77, %77, %77 in 0 : vector<48x32xf32>, vector<48x32xf32>, vector<48x32xf32>, vector<48x32xf32> -> vector<192x32xf32>
    %81 = arith.mulf %80, %29 : vector<192x32xf32>
    %cst_27 = arith.constant dense<0.000000e+00> : vector<32x192xf32>
    %82 = tpu.matmul %57, %79, %cst_27 {dimension_numbers = #tpu.dot_dimension_numbers<[1], [1], [0], [0], [0, 0, 1, 0], [], []>} : vector<32x32xf32>, vector<192x32xf32>, vector<32x192xf32> -> vector<32x192xf32>
    %83 = arith.addf %82, %30 : vector<32x192xf32>
    %cst_28 = arith.constant dense<0xFF800000> : vector<32xf32>
    %84 = vector.multi_reduction <maximumf>, %83, %cst_28 [1] : vector<32x192xf32> to vector<32xf32>
    %85 = vector.shape_cast %84 : vector<32xf32> to vector<32x1xf32>
    %86 = vector.broadcast %85 : vector<32x1xf32> to vector<32x192xf32>
    %87 = arith.subf %83, %86 : vector<32x192xf32>
    %88 = math.exp %87 : vector<32x192xf32>
    %cst_29 = arith.constant dense<0.000000e+00> : vector<32x32xf32>
    %89 = tpu.matmul %88, %81, %cst_29 {dimension_numbers = #tpu.dot_dimension_numbers<[1], [0], [0], [1], [0, 0, 1, 1], [], []>} : vector<32x192xf32>, vector<192x32xf32>, vector<32x32xf32> -> vector<32x32xf32>
    %cst_30 = arith.constant dense<0.000000e+00> : vector<32x32xf32>
    %90 = tpu.matmul %88, %29, %cst_30 {dimension_numbers = #tpu.dot_dimension_numbers<[1], [0], [0], [1], [0, 0, 1, 1], [], []>} : vector<32x192xf32>, vector<192x32xf32>, vector<32x32xf32> -> vector<32x32xf32>
    %cst_31 = arith.constant 1.000000e-30 : f32
    %91 = vector.broadcast %cst_31 : f32 to vector<32x32xf32>
    %92 = arith.maximumf %90, %91 : vector<32x32xf32>
    %93 = tpu.reciprocal %92 {approx = true} : vector<32x32xf32> -> vector<32x32xf32>
    %94 = arith.mulf %89, %93 : vector<32x32xf32>
    %95 = vector.broadcast %31 : vector<32x1xf32> to vector<32x32xf32>
    %96 = arith.mulf %94, %95 : vector<32x32xf32>
    %97 = arith.mulf %96, %96 : vector<32x32xf32>
    %98 = arith.mulf %96, %97 : vector<32x32xf32>
    %cst_32 = arith.constant 4.471500e-02 : f32
    %99 = vector.broadcast %cst_32 : f32 to vector<32x32xf32>
    %100 = arith.mulf %99, %98 : vector<32x32xf32>
    %101 = arith.addf %96, %100 : vector<32x32xf32>
    %cst_33 = arith.constant 0.797884583 : f32
    %102 = vector.broadcast %cst_33 : f32 to vector<32x32xf32>
    %103 = arith.mulf %102, %101 : vector<32x32xf32>
    %104 = math.tanh %103 : vector<32x32xf32>
    %cst_34 = arith.constant 1.000000e+00 : f32
    %105 = vector.broadcast %cst_34 : f32 to vector<32x32xf32>
    %106 = arith.addf %105, %104 : vector<32x32xf32>
    %cst_35 = arith.constant 5.000000e-01 : f32
    %107 = vector.broadcast %cst_35 : f32 to vector<32x32xf32>
    %108 = arith.mulf %107, %106 : vector<32x32xf32>
    %109 = arith.mulf %96, %108 : vector<32x32xf32>
    %110 = vector.extract_strided_slice %109 {offsets = [0, 0], sizes = [16, 32], strides = [1, 1]} : vector<32x32xf32> to vector<16x32xf32>
    %c192_36 = arith.constant 192 : index
    %c0_37 = arith.constant 0 : index
    %111 = vector.load %arg1[%c192_36, %c0_37] : memref<544x128xf32, #tpu.memory_space<vmem>>, vector<32x32xf32>
    %cst_38 = arith.constant dense<0.000000e+00> : vector<16x32xf32>
    %112 = tpu.matmul %110, %111, %cst_38 {dimension_numbers = #tpu.dot_dimension_numbers<[1], [0], [0], [1], [0, 0, 1, 1], [], []>} : vector<16x32xf32>, vector<32x32xf32>, vector<16x32xf32> -> vector<16x32xf32>
    %c6 = arith.constant 6 : index
    %c0_39 = arith.constant 0 : index
    %113 = vector.load %arg2[%c6, %c0_39] : memref<16x128xf32, #tpu.memory_space<vmem>>, vector<1x32xf32>
    %114 = vector.broadcast %113 : vector<1x32xf32> to vector<16x32xf32>
    %115 = arith.addf %112, %114 : vector<16x32xf32>
    %c0_40 = arith.constant 0 : index
    %116 = memref.load %arg5[%c0_40] : memref<4xf32, #tpu.memory_space<smem>>
    %117 = vector.broadcast %116 : f32 to vector<16x32xf32>
    %118 = arith.mulf %117, %115 : vector<16x32xf32>
    %cst_41 = arith.constant 1.000000e+00 : f32
    %119 = arith.subf %cst_41, %116 : f32
    %120 = vector.extract_strided_slice %44 {offsets = [0, 0], sizes = [16, 32], strides = [1, 1]} : vector<32x32xf32> to vector<16x32xf32>
    %121 = vector.broadcast %119 : f32 to vector<16x32xf32>
    %122 = arith.mulf %121, %120 : vector<16x32xf32>
    %123 = arith.addf %118, %122 : vector<16x32xf32>
    %cst_42 = arith.constant 0.000000e+00 : f32
    %124 = vector.broadcast %cst_42 : f32 to vector<16x32xf32>
    %125 = arith.maximumf %123, %124 : vector<16x32xf32>
    %126 = vector.extract_strided_slice %109 {offsets = [16, 0], sizes = [16, 32], strides = [1, 1]} : vector<32x32xf32> to vector<16x32xf32>
    %c224 = arith.constant 224 : index
    %c0_43 = arith.constant 0 : index
    %127 = vector.load %arg1[%c224, %c0_43] : memref<544x128xf32, #tpu.memory_space<vmem>>, vector<32x32xf32>
    %cst_44 = arith.constant dense<0.000000e+00> : vector<16x32xf32>
    %128 = tpu.matmul %126, %127, %cst_44 {dimension_numbers = #tpu.dot_dimension_numbers<[1], [0], [0], [1], [0, 0, 1, 1], [], []>} : vector<16x32xf32>, vector<32x32xf32>, vector<16x32xf32> -> vector<16x32xf32>
    %c7 = arith.constant 7 : index
    %c0_45 = arith.constant 0 : index
    %129 = vector.load %arg2[%c7, %c0_45] : memref<16x128xf32, #tpu.memory_space<vmem>>, vector<1x32xf32>
    %130 = vector.broadcast %129 : vector<1x32xf32> to vector<16x32xf32>
    %131 = arith.addf %128, %130 : vector<16x32xf32>
    %c1_46 = arith.constant 1 : index
    %132 = memref.load %arg5[%c1_46] : memref<4xf32, #tpu.memory_space<smem>>
    %133 = vector.broadcast %132 : f32 to vector<16x32xf32>
    %134 = arith.mulf %133, %131 : vector<16x32xf32>
    %cst_47 = arith.constant 1.000000e+00 : f32
    %135 = arith.subf %cst_47, %132 : f32
    %136 = vector.extract_strided_slice %44 {offsets = [16, 0], sizes = [16, 32], strides = [1, 1]} : vector<32x32xf32> to vector<16x32xf32>
    %137 = vector.broadcast %135 : f32 to vector<16x32xf32>
    %138 = arith.mulf %137, %136 : vector<16x32xf32>
    %139 = arith.addf %134, %138 : vector<16x32xf32>
    %cst_48 = arith.constant 0.000000e+00 : f32
    %140 = vector.broadcast %cst_48 : f32 to vector<16x32xf32>
    %141 = arith.maximumf %139, %140 : vector<16x32xf32>
    %142 = tpu.concatenate %125, %141 in 0 : vector<16x32xf32>, vector<16x32xf32> -> vector<32x32xf32>
    %143 = vector.extract_strided_slice %142 {offsets = [0, 0], sizes = [16, 32], strides = [1, 1]} : vector<32x32xf32> to vector<16x32xf32>
    %c256 = arith.constant 256 : index
    %c0_49 = arith.constant 0 : index
    %144 = vector.load %arg1[%c256, %c0_49] : memref<544x128xf32, #tpu.memory_space<vmem>>, vector<32x32xf32>
    %cst_50 = arith.constant dense<0.000000e+00> : vector<16x32xf32>
    %145 = tpu.matmul %143, %144, %cst_50 {dimension_numbers = #tpu.dot_dimension_numbers<[1], [0], [0], [1], [0, 0, 1, 1], [], []>} : vector<16x32xf32>, vector<32x32xf32>, vector<16x32xf32> -> vector<16x32xf32>
    %c8 = arith.constant 8 : index
    %c0_51 = arith.constant 0 : index
    %146 = vector.load %arg2[%c8, %c0_51] : memref<16x128xf32, #tpu.memory_space<vmem>>, vector<1x32xf32>
    %147 = vector.broadcast %146 : vector<1x32xf32> to vector<16x32xf32>
    %148 = arith.addf %145, %147 : vector<16x32xf32>
    %149 = vector.extract_strided_slice %142 {offsets = [16, 0], sizes = [16, 32], strides = [1, 1]} : vector<32x32xf32> to vector<16x32xf32>
    %c288 = arith.constant 288 : index
    %c0_52 = arith.constant 0 : index
    %150 = vector.load %arg1[%c288, %c0_52] : memref<544x128xf32, #tpu.memory_space<vmem>>, vector<32x32xf32>
    %cst_53 = arith.constant dense<0.000000e+00> : vector<16x32xf32>
    %151 = tpu.matmul %149, %150, %cst_53 {dimension_numbers = #tpu.dot_dimension_numbers<[1], [0], [0], [1], [0, 0, 1, 1], [], []>} : vector<16x32xf32>, vector<32x32xf32>, vector<16x32xf32> -> vector<16x32xf32>
    %c9 = arith.constant 9 : index
    %c0_54 = arith.constant 0 : index
    %152 = vector.load %arg2[%c9, %c0_54] : memref<16x128xf32, #tpu.memory_space<vmem>>, vector<1x32xf32>
    %153 = vector.broadcast %152 : vector<1x32xf32> to vector<16x32xf32>
    %154 = arith.addf %151, %153 : vector<16x32xf32>
    %155 = tpu.concatenate %148, %154 in 0 : vector<16x32xf32>, vector<16x32xf32> -> vector<32x32xf32>
    %156 = vector.extract_strided_slice %142 {offsets = [0, 0], sizes = [16, 32], strides = [1, 1]} : vector<32x32xf32> to vector<16x32xf32>
    %c320 = arith.constant 320 : index
    %c0_55 = arith.constant 0 : index
    %157 = vector.load %arg1[%c320, %c0_55] : memref<544x128xf32, #tpu.memory_space<vmem>>, vector<32x128xf32>
    %cst_56 = arith.constant dense<0.000000e+00> : vector<16x128xf32>
    %158 = tpu.matmul %156, %157, %cst_56 {dimension_numbers = #tpu.dot_dimension_numbers<[1], [0], [0], [1], [0, 0, 1, 1], [], []>} : vector<16x32xf32>, vector<32x128xf32>, vector<16x128xf32> -> vector<16x128xf32>
    %c10 = arith.constant 10 : index
    %c0_57 = arith.constant 0 : index
    %159 = vector.load %arg2[%c10, %c0_57] : memref<16x128xf32, #tpu.memory_space<vmem>>, vector<1x128xf32>
    %160 = vector.broadcast %159 : vector<1x128xf32> to vector<16x128xf32>
    %161 = arith.addf %158, %160 : vector<16x128xf32>
    %162 = vector.extract_strided_slice %161 {offsets = [0, 0], sizes = [16, 32], strides = [1, 1]} : vector<16x128xf32> to vector<16x32xf32>
    %163 = vector.extract_strided_slice %161 {offsets = [0, 64], sizes = [16, 32], strides = [1, 1]} : vector<16x128xf32> to vector<16x32xf32>
    %164 = vector.extract_strided_slice %161 {offsets = [0, 32], sizes = [16, 32], strides = [1, 1]} : vector<16x128xf32> to vector<16x32xf32>
    %165 = vector.extract_strided_slice %161 {offsets = [0, 96], sizes = [16, 32], strides = [1, 1]} : vector<16x128xf32> to vector<16x32xf32>
    %166 = vector.extract_strided_slice %142 {offsets = [16, 0], sizes = [16, 32], strides = [1, 1]} : vector<32x32xf32> to vector<16x32xf32>
    %c352 = arith.constant 352 : index
    %c0_58 = arith.constant 0 : index
    %167 = vector.load %arg1[%c352, %c0_58] : memref<544x128xf32, #tpu.memory_space<vmem>>, vector<32x64xf32>
    %cst_59 = arith.constant dense<0.000000e+00> : vector<16x64xf32>
    %168 = tpu.matmul %166, %167, %cst_59 {dimension_numbers = #tpu.dot_dimension_numbers<[1], [0], [0], [1], [0, 0, 1, 1], [], []>} : vector<16x32xf32>, vector<32x64xf32>, vector<16x64xf32> -> vector<16x64xf32>
    %c11 = arith.constant 11 : index
    %c0_60 = arith.constant 0 : index
    %169 = vector.load %arg2[%c11, %c0_60] : memref<16x128xf32, #tpu.memory_space<vmem>>, vector<1x64xf32>
    %170 = vector.broadcast %169 : vector<1x64xf32> to vector<16x64xf32>
    %171 = arith.addf %168, %170 : vector<16x64xf32>
    %172 = vector.extract_strided_slice %171 {offsets = [0, 0], sizes = [16, 32], strides = [1, 1]} : vector<16x64xf32> to vector<16x32xf32>
    %173 = vector.extract_strided_slice %171 {offsets = [0, 32], sizes = [16, 32], strides = [1, 1]} : vector<16x64xf32> to vector<16x32xf32>
    %174 = tpu.concatenate %162, %164, %172 in 0 : vector<16x32xf32>, vector<16x32xf32>, vector<16x32xf32> -> vector<48x32xf32>
    %175 = tpu.concatenate %163, %165, %173 in 0 : vector<16x32xf32>, vector<16x32xf32>, vector<16x32xf32> -> vector<48x32xf32>
    %176 = tpu.concatenate %174, %174, %174, %174 in 0 : vector<48x32xf32>, vector<48x32xf32>, vector<48x32xf32>, vector<48x32xf32> -> vector<192x32xf32>
    %177 = arith.mulf %176, %29 : vector<192x32xf32>
    %178 = tpu.concatenate %175, %175, %175, %175 in 0 : vector<48x32xf32>, vector<48x32xf32>, vector<48x32xf32>, vector<48x32xf32> -> vector<192x32xf32>
    %179 = arith.mulf %178, %29 : vector<192x32xf32>
    %cst_61 = arith.constant dense<0.000000e+00> : vector<32x192xf32>
    %180 = tpu.matmul %155, %177, %cst_61 {dimension_numbers = #tpu.dot_dimension_numbers<[1], [1], [0], [0], [0, 0, 1, 0], [], []>} : vector<32x32xf32>, vector<192x32xf32>, vector<32x192xf32> -> vector<32x192xf32>
    %181 = arith.addf %180, %30 : vector<32x192xf32>
    %cst_62 = arith.constant dense<0xFF800000> : vector<32xf32>
    %182 = vector.multi_reduction <maximumf>, %181, %cst_62 [1] : vector<32x192xf32> to vector<32xf32>
    %183 = vector.shape_cast %182 : vector<32xf32> to vector<32x1xf32>
    %184 = vector.broadcast %183 : vector<32x1xf32> to vector<32x192xf32>
    %185 = arith.subf %181, %184 : vector<32x192xf32>
    %186 = math.exp %185 : vector<32x192xf32>
    %cst_63 = arith.constant dense<0.000000e+00> : vector<32x32xf32>
    %187 = tpu.matmul %186, %179, %cst_63 {dimension_numbers = #tpu.dot_dimension_numbers<[1], [0], [0], [1], [0, 0, 1, 1], [], []>} : vector<32x192xf32>, vector<192x32xf32>, vector<32x32xf32> -> vector<32x32xf32>
    %cst_64 = arith.constant dense<0.000000e+00> : vector<32x32xf32>
    %188 = tpu.matmul %186, %29, %cst_64 {dimension_numbers = #tpu.dot_dimension_numbers<[1], [0], [0], [1], [0, 0, 1, 1], [], []>} : vector<32x192xf32>, vector<192x32xf32>, vector<32x32xf32> -> vector<32x32xf32>
    %cst_65 = arith.constant 1.000000e-30 : f32
    %189 = vector.broadcast %cst_65 : f32 to vector<32x32xf32>
    %190 = arith.maximumf %188, %189 : vector<32x32xf32>
    %191 = tpu.reciprocal %190 {approx = true} : vector<32x32xf32> -> vector<32x32xf32>
    %192 = arith.mulf %187, %191 : vector<32x32xf32>
    %193 = vector.broadcast %31 : vector<32x1xf32> to vector<32x32xf32>
    %194 = arith.mulf %192, %193 : vector<32x32xf32>
    %195 = arith.mulf %194, %194 : vector<32x32xf32>
    %196 = arith.mulf %194, %195 : vector<32x32xf32>
    %cst_66 = arith.constant 4.471500e-02 : f32
    %197 = vector.broadcast %cst_66 : f32 to vector<32x32xf32>
    %198 = arith.mulf %197, %196 : vector<32x32xf32>
    %199 = arith.addf %194, %198 : vector<32x32xf32>
    %cst_67 = arith.constant 0.797884583 : f32
    %200 = vector.broadcast %cst_67 : f32 to vector<32x32xf32>
    %201 = arith.mulf %200, %199 : vector<32x32xf32>
    %202 = math.tanh %201 : vector<32x32xf32>
    %cst_68 = arith.constant 1.000000e+00 : f32
    %203 = vector.broadcast %cst_68 : f32 to vector<32x32xf32>
    %204 = arith.addf %203, %202 : vector<32x32xf32>
    %cst_69 = arith.constant 5.000000e-01 : f32
    %205 = vector.broadcast %cst_69 : f32 to vector<32x32xf32>
    %206 = arith.mulf %205, %204 : vector<32x32xf32>
    %207 = arith.mulf %194, %206 : vector<32x32xf32>
    %208 = vector.extract_strided_slice %207 {offsets = [0, 0], sizes = [16, 32], strides = [1, 1]} : vector<32x32xf32> to vector<16x32xf32>
    %c384 = arith.constant 384 : index
    %c0_70 = arith.constant 0 : index
    %209 = vector.load %arg1[%c384, %c0_70] : memref<544x128xf32, #tpu.memory_space<vmem>>, vector<32x32xf32>
    %cst_71 = arith.constant dense<0.000000e+00> : vector<16x32xf32>
    %210 = tpu.matmul %208, %209, %cst_71 {dimension_numbers = #tpu.dot_dimension_numbers<[1], [0], [0], [1], [0, 0, 1, 1], [], []>} : vector<16x32xf32>, vector<32x32xf32>, vector<16x32xf32> -> vector<16x32xf32>
    %c12 = arith.constant 12 : index
    %c0_72 = arith.constant 0 : index
    %211 = vector.load %arg2[%c12, %c0_72] : memref<16x128xf32, #tpu.memory_space<vmem>>, vector<1x32xf32>
    %212 = vector.broadcast %211 : vector<1x32xf32> to vector<16x32xf32>
    %213 = arith.addf %210, %212 : vector<16x32xf32>
    %c2_73 = arith.constant 2 : index
    %214 = memref.load %arg5[%c2_73] : memref<4xf32, #tpu.memory_space<smem>>
    %215 = vector.broadcast %214 : f32 to vector<16x32xf32>
    %216 = arith.mulf %215, %213 : vector<16x32xf32>
    %cst_74 = arith.constant 1.000000e+00 : f32
    %217 = arith.subf %cst_74, %214 : f32
    %218 = vector.extract_strided_slice %142 {offsets = [0, 0], sizes = [16, 32], strides = [1, 1]} : vector<32x32xf32> to vector<16x32xf32>
    %219 = vector.broadcast %217 : f32 to vector<16x32xf32>
    %220 = arith.mulf %219, %218 : vector<16x32xf32>
    %221 = arith.addf %216, %220 : vector<16x32xf32>
    %cst_75 = arith.constant 0.000000e+00 : f32
    %222 = vector.broadcast %cst_75 : f32 to vector<16x32xf32>
    %223 = arith.maximumf %221, %222 : vector<16x32xf32>
    %224 = vector.extract_strided_slice %207 {offsets = [16, 0], sizes = [16, 32], strides = [1, 1]} : vector<32x32xf32> to vector<16x32xf32>
    %c416 = arith.constant 416 : index
    %c0_76 = arith.constant 0 : index
    %225 = vector.load %arg1[%c416, %c0_76] : memref<544x128xf32, #tpu.memory_space<vmem>>, vector<32x32xf32>
    %cst_77 = arith.constant dense<0.000000e+00> : vector<16x32xf32>
    %226 = tpu.matmul %224, %225, %cst_77 {dimension_numbers = #tpu.dot_dimension_numbers<[1], [0], [0], [1], [0, 0, 1, 1], [], []>} : vector<16x32xf32>, vector<32x32xf32>, vector<16x32xf32> -> vector<16x32xf32>
    %c13 = arith.constant 13 : index
    %c0_78 = arith.constant 0 : index
    %227 = vector.load %arg2[%c13, %c0_78] : memref<16x128xf32, #tpu.memory_space<vmem>>, vector<1x32xf32>
    %228 = vector.broadcast %227 : vector<1x32xf32> to vector<16x32xf32>
    %229 = arith.addf %226, %228 : vector<16x32xf32>
    %c3_79 = arith.constant 3 : index
    %230 = memref.load %arg5[%c3_79] : memref<4xf32, #tpu.memory_space<smem>>
    %231 = vector.broadcast %230 : f32 to vector<16x32xf32>
    %232 = arith.mulf %231, %229 : vector<16x32xf32>
    %cst_80 = arith.constant 1.000000e+00 : f32
    %233 = arith.subf %cst_80, %230 : f32
    %234 = vector.extract_strided_slice %142 {offsets = [16, 0], sizes = [16, 32], strides = [1, 1]} : vector<32x32xf32> to vector<16x32xf32>
    %235 = vector.broadcast %233 : f32 to vector<16x32xf32>
    %236 = arith.mulf %235, %234 : vector<16x32xf32>
    %237 = arith.addf %232, %236 : vector<16x32xf32>
    %cst_81 = arith.constant 0.000000e+00 : f32
    %238 = vector.broadcast %cst_81 : f32 to vector<16x32xf32>
    %239 = arith.maximumf %237, %238 : vector<16x32xf32>
    %240 = tpu.concatenate %223, %239 in 0 : vector<16x32xf32>, vector<16x32xf32> -> vector<32x32xf32>
    %c0_82 = arith.constant 0 : index
    %c0_83 = arith.constant 0 : index
    %241 = vector.load %arg4[%c0_82, %c0_83] : memref<16x32xf32, #tpu.memory_space<vmem>>, vector<16x32xf32>
    %cst_84 = arith.constant dense<0.000000e+00> : vector<16x32xf32>
    %242 = tpu.matmul %241, %240, %cst_84 {dimension_numbers = #tpu.dot_dimension_numbers<[1], [0], [0], [1], [0, 0, 1, 1], [], []>} : vector<16x32xf32>, vector<32x32xf32>, vector<16x32xf32> -> vector<16x32xf32>
    %243 = vector.extract_strided_slice %242 {offsets = [0, 0], sizes = [8, 32], strides = [1, 1]} : vector<16x32xf32> to vector<8x32xf32>
    %244 = vector.extract_strided_slice %242 {offsets = [8, 0], sizes = [8, 32], strides = [1, 1]} : vector<16x32xf32> to vector<8x32xf32>
    %c448 = arith.constant 448 : index
    %c0_85 = arith.constant 0 : index
    %245 = vector.load %arg1[%c448, %c0_85] : memref<544x128xf32, #tpu.memory_space<vmem>>, vector<32x32xf32>
    %cst_86 = arith.constant dense<0.000000e+00> : vector<8x32xf32>
    %246 = tpu.matmul %243, %245, %cst_86 {dimension_numbers = #tpu.dot_dimension_numbers<[1], [0], [0], [1], [0, 0, 1, 1], [], []>} : vector<8x32xf32>, vector<32x32xf32>, vector<8x32xf32> -> vector<8x32xf32>
    %c480 = arith.constant 480 : index
    %c0_87 = arith.constant 0 : index
    %247 = vector.load %arg1[%c480, %c0_87] : memref<544x128xf32, #tpu.memory_space<vmem>>, vector<32x32xf32>
    %cst_88 = arith.constant dense<0.000000e+00> : vector<8x32xf32>
    %248 = tpu.matmul %244, %247, %cst_88 {dimension_numbers = #tpu.dot_dimension_numbers<[1], [0], [0], [1], [0, 0, 1, 1], [], []>} : vector<8x32xf32>, vector<32x32xf32>, vector<8x32xf32> -> vector<8x32xf32>
    %249 = arith.addf %246, %248 : vector<8x32xf32>
    %c14 = arith.constant 14 : index
    %c0_89 = arith.constant 0 : index
    %250 = vector.load %arg2[%c14, %c0_89] : memref<16x128xf32, #tpu.memory_space<vmem>>, vector<1x32xf32>
    %251 = vector.broadcast %250 : vector<1x32xf32> to vector<8x32xf32>
    %252 = arith.addf %249, %251 : vector<8x32xf32>
    %cst_90 = arith.constant 0.000000e+00 : f32
    %253 = vector.broadcast %cst_90 : f32 to vector<8x32xf32>
    %254 = arith.maximumf %252, %253 : vector<8x32xf32>
    %c512 = arith.constant 512 : index
    %c0_91 = arith.constant 0 : index
    %255 = vector.load %arg1[%c512, %c0_91] : memref<544x128xf32, #tpu.memory_space<vmem>>, vector<32x1xf32>
    %cst_92 = arith.constant dense<0.000000e+00> : vector<8x1xf32>
    %256 = tpu.matmul %254, %255, %cst_92 {dimension_numbers = #tpu.dot_dimension_numbers<[1], [0], [0], [1], [0, 0, 1, 1], [], []>} : vector<8x32xf32>, vector<32x1xf32>, vector<8x1xf32> -> vector<8x1xf32>
    %c15 = arith.constant 15 : index
    %c0_93 = arith.constant 0 : index
    %257 = vector.load %arg2[%c15, %c0_93] : memref<16x128xf32, #tpu.memory_space<vmem>>, vector<1x1xf32>
    %258 = vector.broadcast %257 : vector<1x1xf32> to vector<8x1xf32>
    %259 = arith.addf %256, %258 : vector<8x1xf32>
    %260 = arith.negf %259 : vector<8x1xf32>
    %261 = math.exp %260 : vector<8x1xf32>
    %cst_94 = arith.constant 1.000000e+00 : f32
    %262 = vector.broadcast %cst_94 : f32 to vector<8x1xf32>
    %263 = arith.addf %262, %261 : vector<8x1xf32>
    %264 = arith.divf %262, %263 : vector<8x1xf32>
    %265 = vector.extract_strided_slice %264 {offsets = [0, 0], sizes = [4, 1], strides = [1, 1]} : vector<8x1xf32> to vector<4x1xf32>
    %c0_95 = arith.constant 0 : index
    %c0_96 = arith.constant 0 : index
    %266 = vector.load %arg6[%c0_95, %c0_96] : memref<4x1xf32, #tpu.memory_space<vmem>>, vector<4x1xf32>
    tpu.vector_store %arg6[%c0_95, %c0_96], %265 {strides = array<i32>} : memref<4x1xf32, #tpu.memory_space<vmem>>, vector<4x1xf32>,
    return
  }
}

</mosaic_0001>

<bundles_post_ra>
// kernel: tpu_custom_call.1
= control target key start
LH: loop header
LB: loop body
LE: loop exit
PB: predicated region body
PF: predicated region fallthrough
CT: control target
= control target key end

     0   :  { %11 = vsyncpa [#allocation3], 0  ;;  %s5131_s0 = inlined_call_operand.hbm [shape: f32[32,32], index: 0, kind: input, shape index: {}]   ;;  %s5132_s1 = inlined_call_operand.hbm [shape: f32[544,128], index: 1, kind: input, shape index: {}]   ;;  %s5133_s2 = inlined_call_operand.hbm [shape: f32[16,128], index: 2, kind: input, shape index: {}]   ;;  %s5134_s3 = inlined_call_operand.hbm [shape: f32[32,256], index: 3, kind: input, shape index: {}]   ;;  %s5135_s4 = inlined_call_operand.hbm [shape: f32[16,32], index: 4, kind: input, shape index: {}]   ;;  %s5136_s5 = inlined_call_operand.vmem [shape: f32[4], index: 5, kind: input, shape index: {}]   ;;  %s5137_s6 = inlined_call_operand.vmem [shape: f32[4,1], index: 6, kind: output, shape index: {}]  }
   0x1   :  { %12 = vsyncpa [#allocation6], 0 }
   0x2   :  { %13 = vsyncpa [#allocation9], 0 }
   0x3   :  { %14 = vsyncpa [#allocation4], 0  ;;  %s4220_s21 = smov [#allocation5]   ;;  %s4221_s23 = smov [#allocation8]  }
   0x4   :  { %s32_s22 = sshll.u32 %s4220_s21, 4  ;;  %s56_s24 = sshll.u32 %s4221_s23, 4  ;;  %s33_s22 = int_to_ptr.vmem [resolvable:$true] %s32_s22  ;;  %s4273_s24 = int_to_ptr.vmem [resolvable:$true] %s56_s24 }
   0x5   :  { %s4090_s27 = scalar_lea.hbm %s5132_s1, 8704 }
   0x6   :  { %p4091_p0 = scmp.ne.s32.totalorder %s5132_s1, %s4090_s27  ;;  %p4094_p1 = scmp.lt.u32.totalorder %s4090_s27, %s5132_s1 }
   0x8   :  { %p4096_p2 = pnand %p4094_p1, %p4091_p0 }
   0xa   :  { %4099 = shalt.err (!%p4096_p2)
}
   0xb   :  { %s4100_s8 = scalar_lea.vmem %s33_s22, 8704  ;;  %p4105_p4 = scmp.lt.s32.totalorder %s33_s22, %s33_s22 }
   0xc   :  { %p4101_p3 = scmp.ne.s32.totalorder %s33_s22, %s4100_s8  ;;  %p4106_p5 = scmp.lt.s32.totalorder %s4100_s8, %s4100_s8 }
   0xe   :  { %p4107_p6 = por %p4106_p5, %p4105_p4 }
  0x10   :  { %p4108_p7 = pnand %p4107_p6, %p4101_p3 }
  0x12   :  { %4111 = shalt.err (!%p4108_p7)
}
  0x13   :  { %s4222_s9 = smov 128   ;;  %s4223_s10 = smov 8  }
  0x14   :  { %38 = dma.hbm_to_vmem [thread:$0]  %s5132_s1, 8704, %s33_s22, [#allocation6], %s4222_s9, %s4222_s9, %s4223_s10  }
  0x15   :  { %s4112_s15 = scalar_lea.hbm %s5134_s3, 1024 }
  0x16   :  { %p4113_p8 = scmp.ne.s32.totalorder %s5134_s3, %s4112_s15  ;;  %p4116_p9 = scmp.lt.u32.totalorder %s4112_s15, %s5134_s3 }
  0x18   :  { %p4118_p10 = pnand %p4116_p9, %p4113_p8 }
  0x1a   :  { %4121 = shalt.err (!%p4118_p10)
}
  0x1b   :  { %s4122_s20 = scalar_lea.vmem %s4273_s24, 1024  ;;  %p4127_p12 = scmp.lt.s32.totalorder %s4273_s24, %s4273_s24 }
  0x1c   :  { %p4123_p11 = scmp.ne.s32.totalorder %s4273_s24, %s4122_s20  ;;  %p4128_p13 = scmp.lt.s32.totalorder %s4122_s20, %s4122_s20 }
  0x1e   :  { %p4129_p0 = por %p4128_p13, %p4127_p12 }
  0x20   :  { %p4130_p1 = pnand %p4129_p0, %p4123_p11 }
  0x22   :  { %4133 = shalt.err (!%p4130_p1)
}
  0x23   :  { %s4224_s1 = smov 256   ;;  %s4225_s21 = smov 16  }
  0x24   :  { %62 = dma.hbm_to_vmem [thread:$0]  %s5134_s3, 1024, %s4273_s24, [#allocation9], %s4224_s1, %s4224_s1, %s4225_s21  }
  0x25   :  { %s4226_s25 = smov [#allocation2]   ;;  %s4227_s27 = smov [#allocation7]  }
  0x26   :  { %s20_s26 = sshll.u32 %s4226_s25, 4  ;;  %s44_s28 = sshll.u32 %s4227_s27, 4  ;;  %s21_s26 = int_to_ptr.vmem [resolvable:$true] %s20_s26  ;;  %s4307_s28 = int_to_ptr.vmem [resolvable:$true] %s44_s28 }
  0x27   :  { %s4134_s7 = scalar_lea.hbm %s5131_s0, 512 }
  0x28   :  { %p4135_p2 = scmp.ne.s32.totalorder %s5131_s0, %s4134_s7  ;;  %p4138_p3 = scmp.lt.u32.totalorder %s4134_s7, %s5131_s0 }
  0x2a   :  { %p4140_p4 = pnand %p4138_p3, %p4135_p2 }
  0x2c   :  { %4143 = shalt.err (!%p4140_p4)
}
  0x2d   :  { %s4144_s3 = scalar_lea.vmem %s21_s26, 512  ;;  %p4149_p6 = scmp.lt.s32.totalorder %s21_s26, %s21_s26 }
  0x2e   :  { %p4145_p5 = scmp.ne.s32.totalorder %s21_s26, %s4144_s3  ;;  %p4150_p7 = scmp.lt.s32.totalorder %s4144_s3, %s4144_s3 }
  0x30   :  { %p4151_p8 = por %p4150_p7, %p4149_p6 }
  0x32   :  { %p4152_p9 = pnand %p4151_p8, %p4145_p5 }
  0x34   :  { %4155 = shalt.err (!%p4152_p9)
}
  0x35   :  { %26 = dma.hbm_to_vmem [thread:$0]  %s5131_s0, 512, %s21_s26, [#allocation3], %s4222_s9, %s4222_s9, %s4223_s10  }
  0x36   :  { %s4156_s17 = scalar_lea.hbm %s5133_s2, 256 }
  0x37   :  { %p4157_p10 = scmp.ne.s32.totalorder %s5133_s2, %s4156_s17  ;;  %p4160_p11 = scmp.lt.u32.totalorder %s4156_s17, %s5133_s2 }
  0x39   :  { %p4162_p12 = pnand %p4160_p11, %p4157_p10 }
  0x3b   :  { %4165 = shalt.err (!%p4162_p12)
}
  0x3c   :  { %s4166_s21 = scalar_lea.vmem %s4307_s28, 256  ;;  %p4171_p0 = scmp.lt.s32.totalorder %s4307_s28, %s4307_s28 }
  0x3d   :  { %p4167_p13 = scmp.ne.s32.totalorder %s4307_s28, %s4166_s21  ;;  %p4172_p1 = scmp.lt.s32.totalorder %s4166_s21, %s4166_s21 }
  0x3f   :  { %p4173_p2 = por %p4172_p1, %p4171_p0 }
  0x41   :  { %p4174_p3 = pnand %p4173_p2, %p4167_p13 }
  0x43   :  { %4177 = shalt.err (!%p4174_p3)
}
  0x44   :  { %50 = dma.hbm_to_vmem [thread:$0]  %s5133_s2, 256, %s4307_s28, [#allocation6], %s4222_s9, %s4222_s9, %s4223_s10  }
  0x45   :  { %s81_s26 = sshll.u32 %s5136_s5, 4  ;;  %s4228_s27 = smov [#allocation10]   ;;  %s82_s26 = int_to_ptr.vmem [resolvable:$true] %s81_s26 }
  0x46   :  { %s68_s29 = sshll.u32 %s4228_s27, 4  ;;  %s4178_s8 = scalar_lea.hbm %s5135_s4, 256  ;;  %s69_s29 = int_to_ptr.vmem [resolvable:$true] %s68_s29 }
  0x47   :  { %p4179_p4 = scmp.ne.s32.totalorder %s5135_s4, %s4178_s8  ;;  %p4182_p5 = scmp.lt.u32.totalorder %s4178_s8, %s5135_s4 }
  0x49   :  { %p4184_p6 = pnand %p4182_p5, %p4179_p4 }
  0x4b   :  { %4187 = shalt.err (!%p4184_p6)
}
  0x4c   :  { %s4188_s2 = scalar_lea.vmem %s69_s29, 256  ;;  %p4193_p8 = scmp.lt.s32.totalorder %s69_s29, %s69_s29 }
  0x4d   :  { %p4189_p7 = scmp.ne.s32.totalorder %s69_s29, %s4188_s2  ;;  %p4194_p9 = scmp.lt.s32.totalorder %s4188_s2, %s4188_s2 }
  0x4f   :  { %p4195_p10 = por %p4194_p9, %p4193_p8 }
  0x51   :  { %p4196_p11 = pnand %p4195_p10, %p4189_p7 }
  0x53   :  { %4199 = shalt.err (!%p4196_p11)
}
  0x54   :  { %74 = dma.hbm_to_vmem [thread:$0]  %s5135_s4, 256, %s69_s29, [#allocation9], %s4222_s9, %s4222_s9, %s4223_s10  }
  0x55   :  { %s4200_s24 = scalar_lea.vmem %s82_s26, 16  ;;  %p4205_p13 = scmp.lt.s32.totalorder %s82_s26, %s82_s26 }
  0x56   :  { %p4201_p12 = scmp.ne.s32.totalorder %s82_s26, %s4200_s24  ;;  %p4206_p0 = scmp.lt.s32.totalorder %s4200_s24, %s4200_s24 }
  0x58   :  { %p4207_p1 = por %p4206_p0, %p4205_p13 }
  0x5a   :  { %p4208_p2 = pnand %p4207_p1, %p4201_p12 }
  0x5c   :  { %4211 = shalt.err (!%p4208_p2)
}
  0x5d   :  { %s4229_s14 = smov [#allocation11]  }
  0x5e   :  { %84 = dma.vmem_to_smem %s82_s26, 16, %s4229_s14, [#allocation4]  }
  0x5f   :  { %4212 = dma.done.wait [#allocation3], 512  }
  0x60   :  { %4213 = vsyncadd [#allocation3], 4294966784 }
  0x61   :  { %4214 = dma.done.wait [#allocation6], 8960  }
  0x62   :  { %4215 = vsyncadd [#allocation6], 4294958336 }
  0x63   :  { %4216 = dma.done.wait [#allocation9], 1280  }
  0x64   :  { %4217 = vsyncadd [#allocation9], 4294966016 }
  0x65   :  { %4218 = dma.done.wait [#allocation4], 16  }
  0x66   :  { %4219 = vsyncadd [#allocation4], 4294967280 }
  0x67   :  { %103 = sfence }
  0x68   :  { %v140_v0 = vld [vmem:[#allocation5] sm:$0xff]  ;;  %v141_v1 = vld [vmem:[#allocation5 + $0x8] sm:$0xff]  ;;  %vm149_vm0 = vcmask 261120   ;;  %v142_v5 = vld [vmem:[#allocation5 + $0x10] sm:$0xff]  ;;  %v104_v34 = vlaneseq  ;;  %v5140_v36 = vmov 0.0   ;;  %s4231_s4 = smov 64  }
  0x69   :  { %v233_v2 = vld [vmem:[#allocation5 + $0x20] sm:$0xff]  ;;  %v3496_v3 = vpack.c.bf16 %v141_v1, %v140_v0  ;;  %v234_v4 = vld [vmem:[#allocation5 + $0x28] sm:$0xff]  ;;  %v143_v6 = vld [vmem:[#allocation5 + $0x18] sm:$0xff]  ;;  %v4232_v54 = vmov 0.0|0.0   ;;  %s4233_s9 = smov 96   ;;  %s4234_s10 = smov 32  }
  0x6a   :  { %v3504_v7 = vpack.c.bf16 %v234_v4, %v233_v2  ;;  %v3500_v8 = vpack.c.bf16 %v143_v6, %v142_v5  ;;  %v235_v9 = vld [vmem:[#allocation5 + $0x30] sm:$0xff]  ;;  %v236_v10 = vld [vmem:[#allocation5 + $0x38] sm:$0xff]  ;;  %v138_v11 = vld [vmem:[#allocation2] sm:$0xff]  ;;  %v4366_v35 = vand.u32 127, %v104_v34  ;;  %vm920_vm12 = vcmask 523264   ;;  %s1401_s15 = sld [smem:[#allocation11]] }
  0x6b   :  { %3497 = vmatprep.subr.bf16.mxu0 %v3496_v3  ;;  %v3508_v12 = vpack.c.bf16 %v236_v10, %v235_v9  ;;  %3306 = vmatprep.mubr.msk.f32.mxu0 %vm149_vm0, %v138_v11  ;;  %v231_v13 = vld [vmem:[#allocation2 + $0x10] sm:$0xff]  ;;  %v323_v14 = vld [vmem:[#allocation5 + $0x40] sm:$0xff]  ;;  %v324_v15 = vld [vmem:[#allocation5 + $0x48] sm:$0xff]  ;;  %s4780_s17 = sld [smem:[#allocation11 + $0x1]]  ;;  %s3180_s19 = sld [smem:[#allocation11 + $0x2]] }
  0x6c   :  { %3505 = vmatprep.subr.bf16.mxu1 %v3504_v7  ;;  %3499 = vmatpush3.bf16.msra.mxu0 %v3496_v3  ;;  %v413_v16 = vld [vmem:[#allocation5 + $0x60] sm:$0xff]  ;;  %v3512_v17 = vpack.c.bf16 %v324_v15, %v323_v14  ;;  %v414_v18 = vld [vmem:[#allocation5 + $0x68] sm:$0xff]  ;;  %v232_v21 = vld [vmem:[#allocation2 + $0x18] sm:$0xff]  ;;  %vm107_vm1 = vcmp.lt.s32.totalorder %v4366_v35, 8  ;;  %vm111_vm2 = vcmp.ge.s32.totalorder %v4366_v35, 8  ;;  %vm112_vm3 = vcmp.lt.s32.totalorder %v4366_v35, 16 }
  0x6d   :  { %3507 = vmatpush3.bf16.msra.mxu1 %v3504_v7  ;;  %3501 = vmatprep.subr.bf16.mxu0 %v3500_v8  ;;  %v3520_v19 = vpack.c.bf16 %v414_v18, %v413_v16  ;;  %v139_v20 = vld [vmem:[#allocation2 + $0x8] sm:$0xff]  ;;  %v325_v22 = vld [vmem:[#allocation5 + $0x50] sm:$0xff]  ;;  %v326_v23 = vld [vmem:[#allocation5 + $0x58] sm:$0xff]  ;;  %v4372_v37 = vsel %vm107_vm1, 1.0, %v5140_v36  ;;  %vm116_vm4 = vcmp.ge.s32.totalorder %v4366_v35, 16  ;;  %vm117_vm5 = vcmp.lt.s32.totalorder %v4366_v35, 24 }
  0x6e   :  { %3509 = vmatprep.subr.bf16.mxu1 %v3508_v12  ;;  %3317 = vmatprep.mubr.msk.f32.mxu1 %vm149_vm0, %v231_v13  ;;  %v415_v24 = vld [vmem:[#allocation5 + $0x70] sm:$0xff]  ;;  %v3516_v25 = vpack.c.bf16 %v326_v23, %v325_v22  ;;  %v416_v26 = vld [vmem:[#allocation5 + $0x78] sm:$0xff]  ;;  %v503_v28 = vld [vmem:[#allocation5 + $0x80] sm:$0xff]  ;;  %vm121_vm6 = vcmp.ge.s32.totalorder %v4366_v35, 24  ;;  %vm122_vm7 = vcmp.lt.s32.totalorder %v4366_v35, 32  ;;  %s3184_s1 = sld [smem:[#allocation11 + $0x3]] }
  0x6f   :  { %v3524_v27 = vpack.c.bf16 %v416_v26, %v415_v24  ;;  %v504_v29 = vld [vmem:[#allocation5 + $0x88] sm:$0xff]  ;;  %v587_v31 = vld [vmem:[#allocation5 + $0xa0] sm:$0xff]  ;;  %711 = vrot.lane.b32.xlu1 %v4372_v37, %s4231_s4  ;;  %v505_v41 = vld [vmem:[#allocation5 + $0x90] sm:$0xff] }
  0x70   :  { %3503 = vmatpush3.bf16.msra.mxu0 %v3500_v8  ;;  %v3528_v30 = vpack.c.bf16 %v504_v29, %v503_v28  ;;  %v588_v32 = vld [vmem:[#allocation5 + $0xa8] sm:$0xff]  ;;  %v3020_v38 = vld [vmem:[#allocation7] ss:$0 sm:$0xff]  ;;  %v3023_v39 = vld [vmem:[#allocation7 + $0x1] ss:$0 sm:$0xff]  ;;  %s1405_s16 = ssub.f32 1.0, %s1401_s15 }
  0x71   :  { %3511 = vmatpush3.bf16.msra.mxu1 %v3508_v12  ;;  %3513 = vmatprep.subr.bf16.mxu0 %v3512_v17  ;;  %v3536_v33 = vpack.c.bf16 %v588_v32, %v587_v31  ;;  %v506_v44 = vld [vmem:[#allocation5 + $0x98] sm:$0xff]  ;;  %v589_v45 = vld [vmem:[#allocation5 + $0xb0] sm:$0xff]  ;;  %v3032_v59 = vld [vmem:[#allocation7 + $0x4] ss:$0 sm:$0xff]  ;;  %s1507_s18 = ssub.f32 1.0, %s4780_s17 }
  0x72   :  { %3521 = vmatprep.subr.bf16.mxu1 %v3520_v19  ;;  %v590_v46 = vld [vmem:[#allocation5 + $0xb8] sm:$0xff]  ;;  %v3532_v52 = vpack.c.bf16 %v506_v44, %v505_v41  ;;  %vm4417_vm8 = vmand %vm111_vm2, %vm112_vm3  ;;  %v3035_v0 = vld [vmem:[#allocation7 + $0x5] ss:$0 sm:$0xff]  ;;  %s2564_s20 = ssub.f32 1.0, %s3180_s19  ;;  %vm4237_vm2 = vmmov 0   ;;  %vm3006_vm3 = vcmask 3072  }
  0x73   :  { %3307 = vmatmul.mubr.msk.f32.vlgmr.msra.gmra.mrb[0].mxu0 %vm149_vm0, %v139_v20  ;;  %v3540_v53 = vpack.c.bf16 %v590_v46, %v589_v45  ;;  %vm4421_vm9 = vmand %vm116_vm4, %vm117_vm5  ;;  %v4434_v4 = vsel %vm4417_vm8, 1.0, %v5140_v36  ;;  %v1311_v63 = vld [vmem:[#allocation5 + $0xc0] sm:$0xff] }
  0x74   :  { %3318 = vmatmul.mubr.msk.f32.vlgmr.msra.gmra.mrb[0].mxu1 %vm149_vm0, %v232_v21  ;;  %3515 = vmatpush3.bf16.msra.mxu0 %v3512_v17  ;;  %vm4425_vm10 = vmand %vm121_vm6, %vm122_vm7  ;;  %v4441_v8 = vsel %vm4421_vm9, 1.0, %v5140_v36  ;;  %v2572_v60 = vld [vmem:[#allocation5 + $0x1a0] sm:$0xff]  ;;  %s2666_s21 = ssub.f32 1.0, %s3184_s1 }
  0x75   :  { %3523 = vmatpush3.bf16.msra.mxu1 %v3520_v19  ;;  %3517 = vmatprep.subr.bf16.mxu0 %v3516_v25  ;;  %v4446_v9 = vsel %vm4425_vm10, 1.0, %v5140_v36  ;;  %vm4481_vm11 = vmpackc.low %vm149_vm0, %vm149_vm0 }
  0x76   :  { %3525 = vmatprep.subr.bf16.mxu1 %v3524_v27  ;;  %vm4684_vm13 = vmpackc.low %vm107_vm1, %vm107_vm1 }
  0x77   :  { %vm4706_vm14 = vmpackc.low %vm4417_vm8, %vm4417_vm8 }
  0x78   :  { %3519 = vmatpush3.bf16.msra.mxu0 %v3516_v25  ;;  %vm4727_vm15 = vmpackc.low %vm4421_vm9, %vm4421_vm9 }
  0x79   :  { %3527 = vmatpush3.bf16.msra.mxu1 %v3524_v27  ;;  %3529 = vmatprep.subr.bf16.mxu0 %v3528_v30  ;;  %vm4746_vm1 = vmpackc.low %vm4425_vm10, %vm4425_vm10 }
  0x7a   :  { %3537 = vmatprep.subr.bf16.mxu1 %v3536_v33 }
  0xe1   :  { %v4462_v16 = vpop.permute.xlu1 %711 }
 0x146   :  { %v3308_v40 = vpop.f32.mrb[0].mxu0 }
 0x147   :  { %v3319_v42 = vpop.f32.mrb[0].mxu1  ;;  %v222_v43 = vpop.f32.mrb[1].mxu0  ;;  %v4380_v50 = vadd.f32 %v3308_v40, %v3020_v38 }
 0x148   :  { %v4376_v47 = vadd.f32 %v3319_v42, %v3023_v39  ;;  %v4378_v48 = vadd.f32 %v3020_v38, %v222_v43  ;;  %v314_v49 = vpop.f32.mrb[1].mxu1 }
 0x149   :  { %v4382_v51 = vadd.f32 %v3023_v39, %v314_v49 }
 0x14a   :  { %3328 = vmatprep.mubr.msk.f32.mxu0 %vm149_vm0, %v4378_v48 }
 0x14b   :  { %3339 = vmatprep.mubr.msk.f32.mxu1 %vm149_vm0, %v4382_v51  ;;  %3329 = vmatmul.mubr.msk.f32.vlgmr.msra.gmra.mrb[2].mxu0 %vm149_vm0, %v4380_v50 }
 0x14c   :  { %3340 = vmatmul.mubr.msk.f32.vlgmr.msra.gmra.mrb[2].mxu1 %vm149_vm0, %v4376_v47  ;;  %3531 = vmatpush3.bf16.msra.mxu0 %v3528_v30 }
 0x14d   :  { %3539 = vmatpush3.bf16.msra.mxu1 %v3536_v33  ;;  %3350 = vmatprep.mubr.msk.f32.mxu0 %vm149_vm0, %v4378_v48 }
 0x14e   :  { %3533 = vmatprep.subr.bf16.mxu0 %v3532_v52  ;;  %3541 = vmatprep.subr.bf16.mxu1 %v3540_v53 }
 0x14f   :  { %3361 = vmatprep.mubr.msk.f32.mxu1 %vm149_vm0, %v4382_v51 }
 0x150   :  { %3535 = vmatpush3.bf16.msra.mxu0 %v3532_v52 }
 0x151   :  { %3543 = vmatpush3.bf16.msra.mxu1 %v3540_v53  ;;  %3544 = vmatprep.subr.bf16.mxu0 %v4232_v54 }
 0x152   :  { %3592 = vmatprep.subr.bf16.mxu1 %v4232_v54 }
 0x153   :  { %3351 = vmatmul.mubr.msk.f32.vlgmr.msra.gmra.mrb[4].mxu0 %vm149_vm0, %v4380_v50 }
 0x154   :  { %3362 = vmatmul.mubr.msk.f32.vlgmr.msra.gmra.mrb[4].mxu1 %vm149_vm0, %v4376_v47  ;;  %895 = vmatprep.mubr.f32.mxu0 %v5140_v36 }
 0x21e   :  { %v4403_v55 = vpop.f32.mrb[2].mxu0 }
 0x21f   :  { %v4405_v56 = vpop.f32.mrb[3].mxu0  ;;  %v4407_v57 = vpop.f32.mrb[2].mxu1 }
 0x220   :  { %v4409_v58 = vpop.f32.mrb[3].mxu1 }
 0x226   :  { %v3352_v62 = vpop.f32.mrb[4].mxu0 }
 0x227   :  { %v4429_v1 = vadd.f32 %v3352_v62, %v3032_v59  ;;  %v3363_v2 = vpop.f32.mrb[4].mxu1  ;;  %v578_v3 = vpop.f32.mrb[5].mxu0 }
 0x228   :  { %v668_v5 = vadd.f32 %v3363_v2, %v3035_v0  ;;  %v4436_v6 = vadd.f32 %v3032_v59, %v578_v3  ;;  %v662_v7 = vpop.f32.mrb[5].mxu1 }
 0x229   :  { %v663_v10 = vadd.f32 %v3035_v0, %v662_v7  ;;  %v688_v11 = vmul.f32 %v4372_v37, %v4429_v1  ;;  %v724_v32 = vmul.f32 %v4462_v16, %v4429_v1 }
 0x22a   :  { %v4451_v12 = vmul.f32 %v4372_v37, %v668_v5  ;;  %v4454_v13 = vmul.f32 %v4434_v4, %v668_v5  ;;  %v4457_v14 = vmul.f32 %v4441_v8, %v668_v5  ;;  %v4460_v15 = vmul.f32 %v4446_v9, %v668_v5  ;;  %673 = vrot.lane.b32.xlu0 %v4436_v6, %s4233_s9 }
 0x22b   :  { %v691_v17 = vmul.f32 %v4372_v37, %v663_v10  ;;  %v4468_v18 = vmul.f32 %v4434_v4, %v663_v10  ;;  %v4471_v19 = vmul.f32 %v4441_v8, %v663_v10  ;;  %v4474_v20 = vmul.f32 %v4446_v9, %v663_v10  ;;  %681 = vrot.lane.b32.xlu1 %v663_v10, %s4234_s10 }
 0x22c   :  { %v687_v21 = vmul.f32 %v4372_v37, %v4436_v6  ;;  %v723_v23 = vmul.f32 %v4462_v16, %v4436_v6 }
 0x22d   :  { %v3553_v24 = vpack.c.bf16 %v4451_v12, %v691_v17  ;;  %v3565_v25 = vpack.c.bf16 %v4454_v13, %v4468_v18  ;;  %v3577_v26 = vpack.c.bf16 %v4457_v14, %v4471_v19  ;;  %v3589_v28 = vpack.c.bf16 %v4460_v15, %v4474_v20  ;;  %v3029_v19 = vld [vmem:[#allocation7 + $0x3] ss:$0 sm:$0xff] }
 0x22e   :  { %675 = vrot.lane.b32.xlu0 %v4429_v1, %s4233_s9  ;;  %v3545_v27 = vpack.c.bf16 %v688_v11, %v687_v21  ;;  %v3892_v29 = vpack.i.bf16 %v723_v23, %v4446_v9  ;;  %v694_v23 = vmul.f32 %v4434_v4, %v4429_v1  ;;  %v500_v15 = vadd.f32 %v4407_v57, %v3029_v19 }
 0x22f   :  { %713 = vrot.lane.b32.xlu1 %v4434_v4, %s4231_s4 }
 0x230   :  { %3547 = vmatpush1.bf16.xpose.msk.msra.mxu0 %vm4481_vm11, %v3545_v27 }
 0x231   :  { %3548 = vmatprep.subr.bf16.mxu0 %v4232_v54 }
 0x232   :  { %683 = vrot.lane.b32.xlu0 %v668_v5, %s4234_s10 }
 0x233   :  { %3893 = vrot.lane.b32.xlu1 %v3892_v29, %s4231_s4 }
 0x236   :  { %715 = vrot.lane.b32.xlu0 %v4441_v8, %s4231_s4 }
 0x29c   :  { %v4506_v30 = vpop.permute.xlu0 %673 }
 0x29d   :  { %v4508_v31 = vpop.permute.xlu1 %681  ;;  %v725_v33 = vmul.f32 %v4462_v16, %v4506_v30  ;;  %v689_v42 = vmul.f32 %v4372_v37, %v4506_v30  ;;  %v4533_v53 = vmul.f32 %v4446_v9, %v4506_v30  ;;  %v701_v18 = vmul.f32 %v4441_v8, %v4506_v30 }
 0x29e   :  { %v727_v34 = vmul.f32 %v4462_v16, %v4508_v31 }
 0x29f   :  { %v3897_v38 = vpack.i.bf16 %v725_v33, %v724_v32  ;;  %v693_v33 = vmul.f32 %v4434_v4, %v4436_v6 }
 0x2a0   :  { %v4516_v39 = vpop.permute.xlu0 %675 }
 0x2a1   :  { %v4518_v40 = vpop.permute.xlu1 %713  ;;  %3898 = vrot.lane.b32.xlu0 %v3897_v38, %s4231_s4  ;;  %v726_v41 = vmul.f32 %v4462_v16, %v4516_v39  ;;  %v690_v43 = vmul.f32 %v4372_v37, %v4516_v39  ;;  %v4537_v59 = vmul.f32 %v4446_v9, %v4516_v39  ;;  %v3557_v38 = vpack.c.bf16 %v694_v23, %v693_v33 }
 0x2a2   :  { %v730_v46 = vmul.f32 %v4518_v40, %v4429_v1  ;;  %v731_v49 = vmul.f32 %v4518_v40, %v4506_v30  ;;  %v729_v0 = vmul.f32 %v4518_v40, %v4436_v6  ;;  %v732_v7 = vmul.f32 %v4518_v40, %v4516_v39 }
 0x2a3   :  { %v3907_v44 = vpack.i.bf16 %v727_v34, %v726_v41  ;;  %v3549_v45 = vpack.c.bf16 %v690_v43, %v689_v42  ;;  %v3585_v2 = vpack.c.bf16 %v4537_v59, %v4533_v53  ;;  %v733_v10 = vmul.f32 %v4518_v40, %v4508_v31 }
 0x2a4   :  { %v684_v52 = vpop.permute.xlu0 %683  ;;  %v3912_v3 = vpack.i.bf16 %v731_v49, %v730_v46  ;;  %v696_v46 = vmul.f32 %v4434_v4, %v4516_v39  ;;  %v702_v13 = vmul.f32 %v4441_v8, %v4516_v39 }
 0x2a5   :  { %v728_v62 = vmul.f32 %v4462_v16, %v684_v52  ;;  %3908 = vrot.lane.b32.xlu1 %v3907_v44, %s4231_s4  ;;  %3551 = vmatpush1.bf16.xpose.msk.msra.mxu0 %vm4481_vm11, %v3549_v45  ;;  %v734_v12 = vmul.f32 %v4518_v40, %v684_v52  ;;  %v3917_v17 = vpack.i.bf16 %v733_v10, %v732_v7  ;;  %v4572_v34 = vpop.permute.xlu1 %3893 }
 0x2a6   :  { %3552 = vmatprep.subr.bf16.mxu0 %v4232_v54  ;;  %v4579_v43 = vunpack.i.l.bf16 %v4572_v34  ;;  %v3896_v20 = vunpack.i.h.bf16 %v4572_v34 }
 0x2a7   :  { %v3902_v5 = vpack.i.bf16 %v729_v0, %v728_v62  ;;  %v695_v62 = vmul.f32 %v4434_v4, %v4506_v30 }
 0x2a8   :  { %v4552_v11 = vpop.permute.xlu0 %715  ;;  %v741_v49 = vmul.f32 %v4579_v43, %v4436_v6  ;;  %v743_v7 = vmul.f32 %v4579_v43, %v4506_v30  ;;  %v746_v23 = vmul.f32 %v4579_v43, %v684_v52 }
 0x2a9   :  { %3913 = vrot.lane.b32.xlu1 %v3912_v3, %s4231_s4  ;;  %3903 = vrot.lane.b32.xlu0 %v3902_v5, %s4231_s4  ;;  %v735_v21 = vmul.f32 %v4552_v11, %v4436_v6  ;;  %v736_v29 = vmul.f32 %v4552_v11, %v4429_v1  ;;  %v737_v32 = vmul.f32 %v4552_v11, %v4506_v30 }
 0x2aa   :  { %v738_v41 = vmul.f32 %v4552_v11, %v4516_v39  ;;  %v739_v42 = vmul.f32 %v4552_v11, %v4508_v31  ;;  %v740_v45 = vmul.f32 %v4552_v11, %v684_v52  ;;  %v3561_v3 = vpack.c.bf16 %v696_v46, %v695_v62 }
 0x2ab   :  { %v3922_v27 = vpack.i.bf16 %v735_v21, %v734_v12  ;;  %v742_v5 = vmul.f32 %v4579_v43, %v4429_v1  ;;  %v744_v12 = vmul.f32 %v4579_v43, %v4516_v39  ;;  %v705_v39 = vmul.f32 %v4446_v9, %v4436_v6 }
 0x2ac   :  { %v3932_v44 = vpack.i.bf16 %v739_v42, %v738_v41  ;;  %v3937_v0 = vpack.i.bf16 %v741_v49, %v740_v45  ;;  %v706_v30 = vmul.f32 %v4446_v9, %v4429_v1 }
 0x2ad   :  { %3918 = vrot.lane.b32.xlu0 %v3917_v17, %s4231_s4  ;;  %3555 = vmatpush1.bf16.xpose.msk.msra.mxu0 %vm4481_vm11, %v3553_v24  ;;  %v3927_v24 = vpack.i.bf16 %v737_v32, %v736_v29  ;;  %v3942_v10 = vpack.i.bf16 %v743_v7, %v742_v5  ;;  %v745_v17 = vmul.f32 %v4579_v43, %v4508_v31 }
 0x2ae   :  { %3556 = vmatprep.subr.bf16.mxu0 %v4232_v54  ;;  %v700_v31 = vmul.f32 %v4441_v8, %v4429_v1  ;;  %v3581_v52 = vpack.c.bf16 %v706_v30, %v705_v39  ;;  %v3026_v1 = vld [vmem:[#allocation7 + $0x2] ss:$0 sm:$0xff] }
 0x2af   :  { %v3947_v21 = vpack.i.bf16 %v745_v17, %v744_v12  ;;  %v410_v14 = vadd.f32 %v4403_v55, %v3026_v1 }
 0x2b1   :  { %3923 = vrot.lane.b32.xlu0 %v3922_v27, %s4231_s4  ;;  %v699_v27 = vmul.f32 %v4441_v8, %v4436_v6  ;;  %v405_v6 = vadd.f32 %v3026_v1, %v4405_v56 }
 0x2b3   :  { %v3569_v29 = vpack.c.bf16 %v700_v31, %v699_v27 }
 0x2b5   :  { %3928 = vrot.lane.b32.xlu0 %v3927_v24, %s4231_s4  ;;  %3559 = vmatpush1.bf16.xpose.msk.msra.mxu0 %vm4481_vm11, %v3557_v38 }
 0x2b6   :  { %3560 = vmatprep.subr.bf16.mxu0 %v4232_v54 }
 0x2b9   :  { %3933 = vrot.lane.b32.xlu0 %v3932_v44, %s4231_s4 }
 0x2bd   :  { %3938 = vrot.lane.b32.xlu0 %v3937_v0, %s4231_s4  ;;  %3563 = vmatpush1.bf16.xpose.msk.msra.mxu0 %vm4481_vm11, %v3561_v3 }
 0x2be   :  { %3564 = vmatprep.subr.bf16.mxu0 %v4232_v54 }
 0x2c1   :  { %3943 = vrot.lane.b32.xlu0 %v3942_v10, %s4231_s4 }
 0x2c5   :  { %3948 = vrot.lane.b32.xlu0 %v3947_v21, %s4231_s4  ;;  %3567 = vmatpush1.bf16.xpose.msk.msra.mxu0 %vm4481_vm11, %v3565_v25  ;;  %v3573_v25 = vpack.c.bf16 %v702_v13, %v701_v18 }
 0x2c6   :  { %3568 = vmatprep.subr.bf16.mxu0 %v4232_v54 }
 0x2c9   :  { %1031 = vrot.lane.b32.xlu0 %v746_v23, %s4231_s4 }
 0x2cd   :  { %3571 = vmatpush1.bf16.xpose.msk.msra.mxu0 %vm4481_vm11, %v3569_v29 }
 0x2ce   :  { %3572 = vmatprep.subr.bf16.mxu0 %v4232_v54 }
 0x2d5   :  { %3575 = vmatpush1.bf16.xpose.msk.msra.mxu0 %vm4481_vm11, %v3573_v25 }
 0x2d6   :  { %3576 = vmatprep.subr.bf16.mxu0 %v4232_v54 }
 0x2dd   :  { %3579 = vmatpush1.bf16.xpose.msk.msra.mxu0 %vm4481_vm11, %v3577_v26  ;;  %v495_v26 = vadd.f32 %v3029_v19, %v4409_v58 }
 0x2de   :  { %3580 = vmatprep.subr.bf16.mxu0 %v4232_v54 }
 0x2e5   :  { %3583 = vmatpush1.bf16.xpose.msk.msra.mxu0 %vm4481_vm11, %v3581_v52 }
 0x2e6   :  { %3584 = vmatprep.subr.bf16.mxu0 %v4232_v54 }
 0x2ed   :  { %3587 = vmatpush1.bf16.xpose.msk.msra.mxu0 %vm4481_vm11, %v3585_v2 }
 0x2ee   :  { %3588 = vmatprep.subr.bf16.mxu0 %v4232_v54 }
 0x2f5   :  { %3591 = vmatpush1.bf16.xpose.msk.msra.mxu0 %vm4481_vm11, %v3589_v28 }
 0x2fc   :  { %3062 = vmatmul.mubr.msk.f32.vlgmr.msra.gmra.mrb[6].mxu0 %vm149_vm0, %v405_v6 }
 0x2fd   :  { %901 = vmatprep.mubr.f32.mxu0 %v5140_v36 }
 0x300   :  { %3063 = vmatmul.mubr.msk.f32.gmra.mrb[8].mxu0 %vm149_vm0, %v410_v14 }
 0x301   :  { %907 = vmatprep.mubr.f32.mxu0 %v5140_v36 }
 0x304   :  { %3064 = vmatmul.mubr.msk.f32.gmra.mrb[10].mxu0 %vm149_vm0, %v495_v26 }
 0x305   :  { %913 = vmatprep.mubr.f32.mxu0 %v5140_v36 }
 0x308   :  { %3065 = vmatmul.mubr.msk.f32.gmra.mrb[12].mxu0 %vm149_vm0, %v500_v15 }
 0x313   :  { %v3899_v56 = vpop.permute.xlu0 %3898 }
 0x314   :  { %v3900_v28 = vunpack.i.l.bf16 %v3899_v56  ;;  %v3901_v59 = vunpack.i.h.bf16 %v3899_v56 }
 0x316   :  { %v3593_v55 = vpack.c.bf16 %v3900_v28, %v3896_v20  ;;  %v131_v28 = vld [vmem:[#allocation8 + $0x8] sm:$0xff] }
 0x317   :  { %v3909_v53 = vpop.permute.xlu1 %3908 }
 0x318   :  { %v3910_v2 = vunpack.i.l.bf16 %v3909_v53  ;;  %3594 = vmatpush1.bf16.msra.mxu1 %v3593_v55  ;;  %v3911_v24 = vunpack.i.h.bf16 %v3909_v53  ;;  %v130_v55 = vld [vmem:[#allocation8] sm:$0xff] }
 0x319   :  { %3595 = vmatprep.subr.bf16.mxu1 %v4232_v54 }
 0x31a   :  { %v3596_v58 = vpack.c.bf16 %v3910_v2, %v3901_v59 }
 0x31b   :  { %v3904_v32 = vpop.permute.xlu0 %3903  ;;  %v3914_v33 = vpop.permute.xlu1 %3913 }
 0x31c   :  { %v3905_v38 = vunpack.i.l.bf16 %v3904_v32  ;;  %3597 = vmatpush1.bf16.msra.mxu1 %v3596_v58  ;;  %v3906_v57 = vunpack.i.h.bf16 %v3904_v32  ;;  %v3915_v42 = vunpack.i.l.bf16 %v3914_v33  ;;  %v3916_v49 = vunpack.i.h.bf16 %v3914_v33  ;;  %v133_v32 = vld [vmem:[#allocation8 + $0x18] sm:$0xff]  ;;  %v132_v33 = vld [vmem:[#allocation8 + $0x10] sm:$0xff] }
 0x31d   :  { %3598 = vmatprep.subr.bf16.mxu1 %v4232_v54 }
 0x31e   :  { %v3599_v41 = vpack.c.bf16 %v3905_v38, %v3911_v24  ;;  %v3602_v44 = vpack.c.bf16 %v3915_v42, %v3906_v57 }
 0x31f   :  { %v3919_v34 = vpop.permute.xlu0 %3918 }
 0x320   :  { %3600 = vmatpush1.bf16.msra.mxu1 %v3599_v41  ;;  %v3920_v45 = vunpack.i.l.bf16 %v3919_v34  ;;  %v3921_v5 = vunpack.i.h.bf16 %v3919_v34 }
 0x321   :  { %3601 = vmatprep.subr.bf16.mxu1 %v4232_v54 }
 0x322   :  { %v3605_v62 = vpack.c.bf16 %v3920_v45, %v3916_v49  ;;  %v134_v45 = vld [vmem:[#allocation8 + $0x20] sm:$0xff] }
 0x323   :  { %v3924_v46 = vpop.permute.xlu0 %3923 }
 0x324   :  { %3603 = vmatpush1.bf16.msra.mxu1 %v3602_v44  ;;  %v3925_v0 = vunpack.i.l.bf16 %v3924_v46  ;;  %v3926_v17 = vunpack.i.h.bf16 %v3924_v46  ;;  %v135_v44 = vld [vmem:[#allocation8 + $0x28] sm:$0xff] }
 0x325   :  { %3604 = vmatprep.subr.bf16.mxu1 %v4232_v54 }
 0x326   :  { %v3608_v7 = vpack.c.bf16 %v3925_v0, %v3921_v5 }
 0x327   :  { %v3929_v3 = vpop.permute.xlu0 %3928 }
 0x328   :  { %3606 = vmatpush1.bf16.msra.mxu1 %v3605_v62  ;;  %v3930_v10 = vunpack.i.l.bf16 %v3929_v3  ;;  %v3931_v31 = vunpack.i.h.bf16 %v3929_v3 }
 0x329   :  { %3607 = vmatprep.subr.bf16.mxu1 %v4232_v54 }
 0x32a   :  { %v3611_v21 = vpack.c.bf16 %v3930_v10, %v3926_v17  ;;  %v136_v10 = vld [vmem:[#allocation8 + $0x30] sm:$0xff] }
 0x32b   :  { %v3934_v12 = vpop.permute.xlu0 %3933 }
 0x32c   :  { %3609 = vmatpush1.bf16.msra.mxu1 %v3608_v7  ;;  %v3935_v23 = vunpack.i.l.bf16 %v3934_v12  ;;  %v3936_v25 = vunpack.i.h.bf16 %v3934_v12  ;;  %v137_v7 = vld [vmem:[#allocation8 + $0x38] sm:$0xff] }
 0x32d   :  { %3610 = vmatprep.subr.bf16.mxu1 %v4232_v54 }
 0x32e   :  { %v3614_v29 = vpack.c.bf16 %v3935_v23, %v3931_v31 }
 0x32f   :  { %v3939_v27 = vpop.permute.xlu0 %3938 }
 0x330   :  { %3612 = vmatpush1.bf16.msra.mxu1 %v3611_v21  ;;  %v3940_v13 = vunpack.i.l.bf16 %v3939_v27  ;;  %v3941_v1 = vunpack.i.h.bf16 %v3939_v27 }
 0x331   :  { %3613 = vmatprep.subr.bf16.mxu1 %v4232_v54 }
 0x332   :  { %v3617_v39 = vpack.c.bf16 %v3940_v13, %v3936_v25 }
 0x333   :  { %v3944_v18 = vpop.permute.xlu0 %3943 }
 0x334   :  { %3615 = vmatpush1.bf16.msra.mxu1 %v3614_v29  ;;  %v3945_v30 = vunpack.i.l.bf16 %v3944_v18  ;;  %v3946_v19 = vunpack.i.h.bf16 %v3944_v18  ;;  %v4235_v18 = vmov 64  }
 0x335   :  { %3616 = vmatprep.subr.bf16.mxu1 %v4232_v54  ;;  %3952 = vset.pattern.permute.xlu1 %v4235_v18 }
 0x336   :  { %v3620_v6 = vpack.c.bf16 %v3945_v30, %v3941_v1  ;;  %3953 = vset.pattern.permute.xlu0 %v4235_v18 }
 0x337   :  { %v3949_v52 = vpop.permute.xlu0 %3948 }
 0x338   :  { %3618 = vmatpush1.bf16.msra.mxu1 %v3617_v39  ;;  %v3950_v14 = vunpack.i.l.bf16 %v3949_v52  ;;  %v3951_v56 = vunpack.i.h.bf16 %v3949_v52 }
 0x339   :  { %3619 = vmatprep.subr.bf16.mxu1 %v4232_v54 }
 0x33a   :  { %v3623_v26 = vpack.c.bf16 %v3950_v14, %v3946_v19 }
 0x33b   :  { %v1032_v15 = vpop.permute.xlu0 %1031 }
 0x33c   :  { %3621 = vmatpush1.bf16.msra.mxu1 %v3620_v6  ;;  %v3626_v20 = vpack.c.bf16 %v1032_v15, %v3951_v56 }
 0x33d   :  { %3622 = vmatprep.subr.bf16.mxu1 %v4232_v54 }
 0x340   :  { %3624 = vmatpush1.bf16.msra.mxu1 %v3623_v26 }
 0x341   :  { %3625 = vmatprep.subr.bf16.mxu1 %v4232_v54 }
 0x344   :  { %3627 = vmatpush1.bf16.msra.mxu1 %v3626_v20 }
 0x345   :  { %3628 = vmatprep.subr.bf16.mxu1 %v4232_v54 }
 0x3cf   :  { %v897_v53 = vpop.f32.mrb[6].mxu0 }
 0x3d0   :  { %v899_v59 = vpop.f32.mrb[7].mxu0  ;;  %v898_v58 = vadd.f32 %v897_v53, %v130_v55 }
 0x3d1   :  { %v900_v2 = vadd.f32 %v899_v59, %v131_v28 }
 0x3d3   :  { %v903_v24 = vpop.f32.mrb[8].mxu0  ;;  %v921_v38 = vsel %vm920_vm12, %v900_v2, -inf }
 0x3d4   :  { %v905_v57 = vpop.f32.mrb[9].mxu0  ;;  %v922_v41 = vmax.f32 %v898_v58, %v921_v38  ;;  %v904_v34 = vadd.f32 %v903_v24, %v132_v33 }
 0x3d5   :  { %v906_v42 = vadd.f32 %v905_v57, %v133_v32  ;;  %v2470_v57 = vld [vmem:[#allocation5 + $0x180] sm:$0xff] }
 0x3d6   :  { %923 = vmax.xlane.f32.xlu1 %v922_v41 }
 0x3d7   :  { %v909_v46 = vpop.f32.mrb[10].mxu0  ;;  %v925_v49 = vsel %vm920_vm12, %v906_v42, -inf }
 0x3d8   :  { %v911_v62 = vpop.f32.mrb[11].mxu0  ;;  %v926_v0 = vmax.f32 %v904_v34, %v925_v49  ;;  %v910_v5 = vadd.f32 %v909_v46, %v134_v45  ;;  %v2471_v49 = vld [vmem:[#allocation5 + $0x188] sm:$0xff] }
 0x3d9   :  { %v912_v3 = vadd.f32 %v911_v62, %v135_v44  ;;  %v1312_v62 = vld [vmem:[#allocation5 + $0xc8] sm:$0xff] }
 0x3da   :  { %927 = vmax.xlane.f32.xlu0 %v926_v0  ;;  %v3664_v0 = vpack.c.bf16 %v1312_v62, %v1311_v63 }
 0x3db   :  { %v915_v12 = vpop.f32.mrb[12].mxu0  ;;  %v929_v17 = vsel %vm920_vm12, %v912_v3, -inf }
 0x3dc   :  { %v917_v21 = vpop.f32.mrb[13].mxu0  ;;  %v930_v23 = vmax.f32 %v910_v5, %v929_v17  ;;  %v916_v31 = vadd.f32 %v915_v12, %v136_v10  ;;  %3665 = vmatprep.subr.bf16.mxu0 %v3664_v0  ;;  %v1413_v10 = vld [vmem:[#allocation5 + $0xe0] sm:$0xff]  ;;  %v1414_v12 = vld [vmem:[#allocation5 + $0xe8] sm:$0xff] }
 0x3dd   :  { %v918_v27 = vadd.f32 %v917_v21, %v137_v7  ;;  %3667 = vmatpush3.bf16.msra.mxu0 %v3664_v0  ;;  %v3672_v17 = vpack.c.bf16 %v1414_v12, %v1413_v10  ;;  %v1415_v21 = vld [vmem:[#allocation5 + $0xf0] sm:$0xff] }
 0x3de   :  { %931 = vmax.xlane.f32.xlu1 %v930_v23  ;;  %v1416_v23 = vld [vmem:[#allocation5 + $0xf8] sm:$0xff] }
 0x3df   :  { %v933_v29 = vsel %vm920_vm12, %v918_v27, -inf }
 0x3e0   :  { %v934_v13 = vmax.f32 %v916_v31, %v933_v29 }
 0x3e2   :  { %935 = vmax.xlane.f32.xlu1 %v934_v13 }
 0x3f0   :  { %1263 = vperm.xlu0 %3953, %v135_v44  }
 0x3f3   :  { %1253 = vperm.xlu1 %3952, %v131_v28  }
 0x3f7   :  { %1258 = vperm.xlu1 %3952, %v133_v32  }
 0x3fb   :  { %1268 = vperm.xlu1 %3952, %v137_v7  }
 0x463   :  { %v924_v25 = vpop.xlane.xlu1 %923 }
 0x464   :  { %v937_v39 = vsub.f32 %v898_v58, %v924_v25  ;;  %v938_v30 = vsub.f32 %v900_v2, %v924_v25 }
 0x466   :  { %v945_v52 = vmul.f32 1.442695, %v937_v39  ;;  %v947_v1 = vmul.f32 1.442695, %v938_v30 }
 0x467   :  { %v928_v6 = vpop.xlane.xlu0 %927 }
 0x468   :  { %4014 = vpow2.f32 %v945_v52  ;;  %v939_v14 = vsub.f32 %v904_v34, %v928_v6  ;;  %v940_v19 = vsub.f32 %v906_v42, %v928_v6  ;;  %v5138_v42 = vmov 1.0|1.0  }
 0x469   :  { %4016 = vpow2.f32 %v947_v1 }
 0x46a   :  { %v949_v26 = vmul.f32 1.442695, %v939_v14  ;;  %v951_v15 = vmul.f32 1.442695, %v940_v19 }
 0x46b   :  { %v932_v56 = vpop.xlane.xlu1 %931 }
 0x46c   :  { %4018 = vpow2.f32 %v949_v26  ;;  %v941_v20 = vsub.f32 %v910_v5, %v932_v56  ;;  %v942_v55 = vsub.f32 %v912_v3, %v932_v56  ;;  %v1313_v3 = vld [vmem:[#allocation5 + $0xd0] sm:$0xff]  ;;  %v1314_v5 = vld [vmem:[#allocation5 + $0xd8] sm:$0xff] }
 0x46d   :  { %4020 = vpow2.f32 %v951_v15  ;;  %v3668_v7 = vpack.c.bf16 %v1314_v5, %v1313_v3 }
 0x46e   :  { %v953_v28 = vmul.f32 1.442695, %v941_v20  ;;  %v955_v53 = vmul.f32 1.442695, %v942_v55 }
 0x46f   :  { %v936_v59 = vpop.xlane.xlu1 %935  ;;  %3669 = vmatprep.subr.bf16.mxu0 %v3668_v7 }
 0x470   :  { %4022 = vpow2.f32 %v953_v28  ;;  %v943_v58 = vsub.f32 %v916_v31, %v936_v59  ;;  %v944_v2 = vsub.f32 %v918_v27, %v936_v59  ;;  %3671 = vmatpush3.bf16.msra.mxu0 %v3668_v7  ;;  %v3676_v27 = vpack.c.bf16 %v1416_v23, %v1415_v21 }
 0x471   :  { %4024 = vpow2.f32 %v955_v53 }
 0x472   :  { %v4015_v32 = vpop.eup %4014  ;;  %v957_v33 = vmul.f32 1.442695, %v943_v58  ;;  %v959_v24 = vmul.f32 1.442695, %v944_v2 }
 0x473   :  { %v4017_v38 = vpop.eup %4016  ;;  %v4764_v59 = vpop.permute.xlu1 %1253 }
 0x474   :  { %4026 = vpow2.f32 %v957_v33  ;;  %3066 = vmatprep.mubr.msk.f32.mxu1 %vm920_vm12, %v4017_v38 }
 0x475   :  { %4028 = vpow2.f32 %v959_v24  ;;  %1134 = vmatmul.mubr.f32.vlgmr.msra.gmra.mrb[6].mxu1 %v4015_v32 }
 0x476   :  { %v4019_v41 = vpop.eup %4018  ;;  %3630 = vmatpush1.bf16.msk.msra.mxu1 %vm4684_vm13, %v5138_v42 }
 0x477   :  { %v4021_v34 = vpop.eup %4020  ;;  %3631 = vmatprep.subr.bf16.mxu1 %v4232_v54 }
 0x478   :  { %3067 = vmatprep.mubr.msk.f32.mxu1 %vm920_vm12, %v4021_v34 }
 0x479   :  { %1139 = vmatmul.mubr.f32.gmra.mrb[8].mxu1 %v4019_v41 }
 0x47a   :  { %v4023_v35 = vpop.eup %4022  ;;  %3633 = vmatpush1.bf16.msk.msra.mxu1 %vm4684_vm13, %v5138_v42 }
 0x47b   :  { %v4025_v44 = vpop.eup %4024  ;;  %3634 = vmatprep.subr.bf16.mxu1 %v4232_v54 }
 0x47c   :  { %3068 = vmatprep.mubr.msk.f32.mxu1 %vm920_vm12, %v4025_v44 }
 0x47d   :  { %1144 = vmatmul.mubr.f32.gmra.mrb[10].mxu1 %v4023_v35 }
 0x47e   :  { %v4027_v45 = vpop.eup %4026  ;;  %3636 = vmatpush1.bf16.msk.msra.mxu1 %vm4684_vm13, %v5138_v42 }
 0x47f   :  { %v4029_v46 = vpop.eup %4028  ;;  %3637 = vmatprep.subr.bf16.mxu1 %v4232_v54 }
 0x480   :  { %3069 = vmatprep.mubr.msk.f32.mxu1 %vm920_vm12, %v4029_v46 }
 0x481   :  { %1149 = vmatmul.mubr.f32.gmra.mrb[12].mxu1 %v4027_v45 }
 0x482   :  { %3639 = vmatpush1.bf16.msk.msra.mxu1 %vm4706_vm14, %v5138_v42  ;;  %3094 = vmatprep.mubr.msk.f32.mxu1 %vm920_vm12, %v4017_v38 }
 0x483   :  { %3640 = vmatprep.subr.bf16.mxu1 %v4232_v54 }
 0x486   :  { %3642 = vmatpush1.bf16.msk.msra.mxu1 %vm4706_vm14, %v5138_v42 }
 0x487   :  { %3643 = vmatprep.subr.bf16.mxu1 %v4232_v54 }
 0x48a   :  { %3645 = vmatpush1.bf16.msk.msra.mxu1 %vm4706_vm14, %v5138_v42 }
 0x48b   :  { %3646 = vmatprep.subr.bf16.mxu1 %v4232_v54 }
 0x48e   :  { %3648 = vmatpush1.bf16.msk.msra.mxu1 %vm4727_vm15, %v5138_v42 }
 0x48f   :  { %3649 = vmatprep.subr.bf16.mxu1 %v4232_v54 }
 0x492   :  { %3651 = vmatpush1.bf16.msk.msra.mxu1 %vm4727_vm15, %v5138_v42 }
 0x493   :  { %3652 = vmatprep.subr.bf16.mxu1 %v4232_v54 }
 0x496   :  { %3654 = vmatpush1.bf16.msk.msra.mxu1 %vm4727_vm15, %v5138_v42 }
 0x497   :  { %3655 = vmatprep.subr.bf16.mxu1 %v4232_v54 }
 0x49a   :  { %3657 = vmatpush1.bf16.msk.msra.mxu1 %vm4746_vm1, %v5138_v42 }
 0x49b   :  { %3658 = vmatprep.subr.bf16.mxu1 %v4232_v54 }
 0x49e   :  { %3660 = vmatpush1.bf16.msk.msra.mxu1 %vm4746_vm1, %v5138_v42 }
 0x49f   :  { %3661 = vmatprep.subr.bf16.mxu1 %v4232_v54 }
 0x4a2   :  { %3663 = vmatpush1.bf16.msk.msra.mxu1 %vm4746_vm1, %v5138_v42 }
 0x4a3   :  { %3673 = vmatprep.subr.bf16.mxu1 %v3672_v17 }
 0x4a5   :  { %1219 = vmatmul.mubr.f32.vlgmr.msra.gmra.mrb[14].mxu1 %v4015_v32 }
 0x4a6   :  { %3095 = vmatprep.mubr.msk.f32.mxu1 %vm920_vm12, %v4021_v34  ;;  %3675 = vmatpush3.bf16.msra.mxu1 %v3672_v17  ;;  %v4767_v34 = vpop.permute.xlu1 %1258 }
 0x4a7   :  { %3677 = vmatprep.subr.bf16.mxu1 %v3676_v27 }
 0x4a9   :  { %1224 = vmatmul.mubr.f32.gmra.mrb[16].mxu1 %v4019_v41 }
 0x4aa   :  { %3096 = vmatprep.mubr.msk.f32.mxu1 %vm920_vm12, %v4025_v44  ;;  %3679 = vmatpush3.bf16.msra.mxu1 %v3676_v27  ;;  %v4773_v27 = vpop.permute.xlu1 %1268 }
 0x4ad   :  { %1229 = vmatmul.mubr.f32.gmra.mrb[18].mxu1 %v4023_v35 }
 0x4ae   :  { %3097 = vmatprep.mubr.msk.f32.mxu1 %vm920_vm12, %v4029_v46  ;;  %v4770_v46 = vpop.permute.xlu0 %1263 }
 0x4b1   :  { %1234 = vmatmul.mubr.f32.gmra.mrb[20].mxu1 %v4027_v45 }
 0x548   :  { %v1135_v31 = vpop.f32.mrb[6].mxu1 }
 0x549   :  { %v1137_v29 = vpop.f32.mrb[7].mxu1 }
 0x54c   :  { %v1140_v13 = vpop.f32.mrb[8].mxu1 }
 0x54d   :  { %v1142_v18 = vpop.f32.mrb[9].mxu1 }
 0x550   :  { %v1145_v25 = vpop.f32.mrb[10].mxu1 }
 0x551   :  { %v1147_v39 = vpop.f32.mrb[11].mxu1 }
 0x554   :  { %v1150_v30 = vpop.f32.mrb[12].mxu1 }
 0x555   :  { %v1152_v52 = vpop.f32.mrb[13].mxu1 }
 0x578   :  { %v1220_v1 = vpop.f32.mrb[14].mxu1 }
 0x579   :  { %v1239_v6 = vmax.f32 %v1220_v1, 1e-30  ;;  %v1222_v14 = vpop.f32.mrb[15].mxu1 }
 0x57b   :  { %4030 = vrcp.f32 %v1239_v6 }
 0x57c   :  { %v1225_v19 = vpop.f32.mrb[16].mxu1 }
 0x57d   :  { %v1240_v26 = vmax.f32 %v1225_v19, 1e-30  ;;  %v1227_v15 = vpop.f32.mrb[17].mxu1 }
 0x57f   :  { %4032 = vrcp.f32 %v1240_v26 }
 0x580   :  { %v1230_v56 = vpop.f32.mrb[18].mxu1 }
 0x581   :  { %v1241_v20 = vmax.f32 %v1230_v56, 1e-30  ;;  %v1232_v55 = vpop.f32.mrb[19].mxu1 }
 0x583   :  { %4034 = vrcp.f32 %v1241_v20 }
 0x584   :  { %v1235_v28 = vpop.f32.mrb[20].mxu1 }
 0x585   :  { %v4031_v53 = vpop.eup %4030  ;;  %v1242_v58 = vmax.f32 %v1235_v28, 1e-30  ;;  %v1237_v2 = vpop.f32.mrb[21].mxu1 }
 0x586   :  { %v1247_v32 = vmul.f32 %v4031_v53, %v1135_v31 }
 0x587   :  { %4036 = vrcp.f32 %v1242_v58 }
 0x588   :  { %v1271_v33 = vmul.f32 %v4764_v59, %v1247_v32 }
 0x589   :  { %v4033_v24 = vpop.eup %4032 }
 0x58a   :  { %v1275_v38 = vmul.f32 %v1271_v33, %v1271_v33  ;;  %v1248_v41 = vmul.f32 %v4033_v24, %v1140_v13 }
 0x58c   :  { %v1279_v35 = vmul.f32 %v1275_v38, %v1271_v33  ;;  %v1272_v44 = vmul.f32 %v4767_v34, %v1248_v41 }
 0x58d   :  { %v4035_v45 = vpop.eup %4034 }
 0x58e   :  { %v1283_v63 = vmul.f32 0.044715, %v1279_v35  ;;  %v1276_v62 = vmul.f32 %v1272_v44, %v1272_v44  ;;  %v1249_v0 = vmul.f32 %v4035_v45, %v1145_v25 }
 0x590   :  { %v1287_v3 = vadd.f32 %v1283_v63, %v1271_v33  ;;  %v1280_v5 = vmul.f32 %v1276_v62, %v1272_v44  ;;  %v1273_v7 = vmul.f32 %v4770_v46, %v1249_v0  ;;  %v1515_v62 = vld [vmem:[#allocation5 + $0x100] sm:$0xff] }
 0x591   :  { %v4037_v10 = vpop.eup %4036 }
 0x592   :  { %v1291_v12 = vmul.f32 0.7978846, %v1287_v3  ;;  %v1284_v17 = vmul.f32 0.044715, %v1280_v5  ;;  %v1250_v21 = vmul.f32 %v4037_v10, %v1150_v30  ;;  %v1277_v23 = vmul.f32 %v1273_v7, %v1273_v7  ;;  %v1517_v3 = vld [vmem:[#allocation5 + $0x110] sm:$0xff]  ;;  %v1605_v10 = vld [vmem:[#allocation5 + $0x120] sm:$0xff] }
 0x594   :  { %4038 = vtanh.f32 %v1291_v12  ;;  %v1288_v31 = vadd.f32 %v1284_v17, %v1272_v44  ;;  %v1274_v29 = vmul.f32 %v4773_v27, %v1250_v21  ;;  %v1281_v13 = vmul.f32 %v1277_v23, %v1273_v7  ;;  %v1606_v12 = vld [vmem:[#allocation5 + $0x128] sm:$0xff]  ;;  %v1695_v17 = vld [vmem:[#allocation5 + $0x140] sm:$0xff] }
 0x595   :  { %v1696_v21 = vld [vmem:[#allocation5 + $0x148] sm:$0xff] }
 0x596   :  { %v1292_v18 = vmul.f32 0.7978846, %v1288_v31  ;;  %v1278_v39 = vmul.f32 %v1274_v29, %v1274_v29  ;;  %v1285_v52 = vmul.f32 0.044715, %v1281_v13  ;;  %v3696_v23 = vpack.c.bf16 %v1696_v21, %v1695_v17  ;;  %v1607_v31 = vld [vmem:[#allocation5 + $0x130] sm:$0xff]  ;;  %v1782_v17 = vld [vmem:[#allocation5 + $0x178] sm:$0xff] }
 0x598   :  { %4040 = vtanh.f32 %v1292_v18  ;;  %v1282_v25 = vmul.f32 %v1278_v39, %v1274_v29  ;;  %v1289_v1 = vadd.f32 %v1285_v52, %v1273_v7  ;;  %v1779_v18 = vld [vmem:[#allocation5 + $0x160] sm:$0xff]  ;;  %v1780_v39 = vld [vmem:[#allocation5 + $0x168] sm:$0xff] }
 0x599   :  { %v3704_v52 = vpack.c.bf16 %v1780_v39, %v1779_v18 }
 0x59a   :  { %v1286_v6 = vmul.f32 0.044715, %v1282_v25  ;;  %v1293_v14 = vmul.f32 0.7978846, %v1289_v1  ;;  %v3098_v25 = vld [vmem:[#allocation7 + $0x6] ss:$0 sm:$0xff]  ;;  %v1406_v1 = vstv %s1405_s16 }
 0x59c   :  { %v1290_v19 = vadd.f32 %v1286_v6, %v1274_v29  ;;  %4042 = vtanh.f32 %v1293_v14  ;;  %v1402_v14 = vstv %s1401_s15 }
 0x59e   :  { %v4039_v26 = vpop.eup %4038  ;;  %v1294_v30 = vmul.f32 0.7978846, %v1290_v19 }
 0x59f   :  { %v1299_v15 = vadd.f32 1.0, %v4039_v26 }
 0x5a0   :  { %4044 = vtanh.f32 %v1294_v30 }
 0x5a1   :  { %v1303_v56 = vmul.f32 0.5, %v1299_v15  ;;  %v1408_v15 = vmul.f32 %v1406_v1, %v4380_v50 }
 0x5a2   :  { %v4041_v20 = vpop.eup %4040 }
 0x5a3   :  { %v1300_v55 = vadd.f32 1.0, %v4041_v20  ;;  %v1307_v28 = vmul.f32 %v1303_v56, %v1271_v33  ;;  %v1516_v33 = vld [vmem:[#allocation5 + $0x108] sm:$0xff]  ;;  %v1407_v20 = vmul.f32 %v1406_v1, %v4378_v48 }
 0x5a4   :  { %v3680_v0 = vpack.c.bf16 %v1516_v33, %v1515_v62 }
 0x5a5   :  { %v1304_v53 = vmul.f32 0.5, %v1300_v55  ;;  %3372 = vmatprep.mubr.msk.f32.mxu0 %vm149_vm0, %v1307_v28 }
 0x5a6   :  { %v4043_v58 = vpop.eup %4042  ;;  %3681 = vmatprep.subr.bf16.mxu0 %v3680_v0 }
 0x5a7   :  { %v1308_v2 = vmul.f32 %v1304_v53, %v1272_v44  ;;  %v1301_v32 = vadd.f32 1.0, %v4043_v58  ;;  %v1518_v44 = vld [vmem:[#allocation5 + $0x118] sm:$0xff]  ;;  %v3101_v58 = vld [vmem:[#allocation7 + $0x7] ss:$0 sm:$0xff] }
 0x5a8   :  { %v3684_v5 = vpack.c.bf16 %v1518_v44, %v1517_v3 }
 0x5a9   :  { %3373 = vmatmul.mubr.msk.f32.vlgmr.msra.gmra.mrb[14].mxu0 %vm149_vm0, %v1308_v2  ;;  %v1305_v24 = vmul.f32 0.5, %v1301_v32  ;;  %v1697_v2 = vld [vmem:[#allocation5 + $0x150] sm:$0xff]  ;;  %v1698_v32 = vld [vmem:[#allocation5 + $0x158] sm:$0xff] }
 0x5aa   :  { %v4045_v38 = vpop.eup %4044  ;;  %3683 = vmatpush3.bf16.msra.mxu0 %v3680_v0  ;;  %v3700_v50 = vpack.c.bf16 %v1698_v32, %v1697_v2 }
 0x5ab   :  { %v1302_v41 = vadd.f32 1.0, %v4045_v38  ;;  %v1309_v35 = vmul.f32 %v1305_v24, %v1273_v7  ;;  %3685 = vmatprep.subr.bf16.mxu0 %v3684_v5  ;;  %v3688_v7 = vpack.c.bf16 %v1606_v12, %v1605_v10  ;;  %v1508_v24 = vstv %s1507_s18  ;;  %v1781_v12 = vld [vmem:[#allocation5 + $0x170] sm:$0xff] }
 0x5ac   :  { %v1510_v48 = vmul.f32 %v1508_v24, %v4376_v47  ;;  %v1509_v3 = vmul.f32 %v1508_v24, %v4382_v51  ;;  %v3708_v21 = vpack.c.bf16 %v1782_v17, %v1781_v12 }
 0x5ad   :  { %v1306_v45 = vmul.f32 0.5, %v1302_v41  ;;  %3383 = vmatprep.mubr.msk.f32.mxu1 %vm149_vm0, %v1309_v35  ;;  %3689 = vmatprep.subr.bf16.mxu1 %v3688_v7  ;;  %v1504_v35 = vstv %s4780_s17 }
 0x5ae   :  { %3687 = vmatpush3.bf16.msra.mxu0 %v3684_v5 }
 0x5af   :  { %v1310_v63 = vmul.f32 %v1306_v45, %v1274_v29  ;;  %3697 = vmatprep.subr.bf16.mxu0 %v3696_v23  ;;  %v1608_v29 = vld [vmem:[#allocation5 + $0x138] sm:$0xff] }
 0x5b0   :  { %v3692_v13 = vpack.c.bf16 %v1608_v29, %v1607_v31  ;;  %v3111_v31 = vld [vmem:[#allocation7 + $0xa] ss:$0 sm:$0xff] }
 0x5b1   :  { %3384 = vmatmul.mubr.msk.f32.vlgmr.msra.gmra.mrb[22].mxu1 %vm149_vm0, %v1310_v63 }
 0x5b2   :  { %3691 = vmatpush3.bf16.msra.mxu1 %v3688_v7 }
 0x5b3   :  { %3693 = vmatprep.subr.bf16.mxu1 %v3692_v13 }
 0x5b6   :  { %3695 = vmatpush3.bf16.msra.mxu1 %v3692_v13 }
 0x5b7   :  { %3705 = vmatprep.subr.bf16.mxu1 %v3704_v52 }
 0x67c   :  { %v3374_v6 = vpop.f32.mrb[14].mxu0 }
 0x67d   :  { %v1398_v19 = vadd.f32 %v3374_v6, %v3098_v25  ;;  %v1392_v26 = vpop.f32.mrb[15].mxu0 }
 0x67e   :  { %v1393_v30 = vadd.f32 %v3098_v25, %v1392_v26 }
 0x67f   :  { %v1404_v56 = vmul.f32 %v1402_v14, %v1398_v19 }
 0x680   :  { %v1403_v55 = vmul.f32 %v1402_v14, %v1393_v30 }
 0x681   :  { %v1410_v28 = vadd.f32 %v1408_v15, %v1404_v56 }
 0x682   :  { %v1409_v53 = vadd.f32 %v1407_v20, %v1403_v55 }
 0x683   :  { %v4788_v45 = vmax.f32 %v1410_v28, 0.0 }
 0x684   :  { %v4785_v38 = vmax.f32 %v1409_v53, 0.0  ;;  %v3385_v41 = vpop.f32.mrb[22].mxu1 }
 0x685   :  { %v1500_v63 = vadd.f32 %v3385_v41, %v3101_v58  ;;  %v1494_v62 = vpop.f32.mrb[23].mxu1 }
 0x686   :  { %v1495_v33 = vadd.f32 %v3101_v58, %v1494_v62  ;;  %3394 = vmatprep.mubr.msk.f32.mxu0 %vm149_vm0, %v4785_v38  ;;  %v3114_v58 = vld [vmem:[#allocation7 + $0xb] ss:$0 sm:$0xff] }
 0x687   :  { %v1506_v0 = vmul.f32 %v1504_v35, %v1500_v63  ;;  %3395 = vmatmul.mubr.msk.f32.vlgmr.msra.gmra.mrb[16].mxu0 %vm149_vm0, %v4788_v45 }
 0x688   :  { %v1505_v44 = vmul.f32 %v1504_v35, %v1495_v33  ;;  %3699 = vmatpush3.bf16.msra.mxu0 %v3696_v23  ;;  %3416 = vmatprep.mubr.msk.f32.mxu0 %vm149_vm0, %v4785_v38 }
 0x689   :  { %v1512_v5 = vadd.f32 %v1510_v48, %v1506_v0  ;;  %3701 = vmatprep.subr.bf16.mxu0 %v3700_v50 }
 0x68a   :  { %v1511_v10 = vadd.f32 %v1509_v3, %v1505_v44 }
 0x68b   :  { %v4800_v47 = vmax.f32 %v1512_v5, 0.0 }
 0x68c   :  { %v4798_v7 = vmax.f32 %v1511_v10, 0.0  ;;  %3703 = vmatpush3.bf16.msra.mxu0 %v3700_v50 }
 0x68d   :  { %3712 = vmatprep.subr.bf16.mxu0 %v4232_v54 }
 0x68e   :  { %3405 = vmatprep.mubr.msk.f32.mxu1 %vm149_vm0, %v4798_v7 }
 0x68f   :  { %3417 = vmatmul.mubr.msk.f32.vlgmr.msra.gmra.mrb[18].mxu0 %vm149_vm0, %v4788_v45  ;;  %3406 = vmatmul.mubr.msk.f32.vlgmr.msra.gmra.mrb[24].mxu1 %vm149_vm0, %v4800_v47 }
 0x690   :  { %3707 = vmatpush3.bf16.msra.mxu1 %v3704_v52  ;;  %3427 = vmatprep.mubr.msk.f32.mxu1 %vm149_vm0, %v4798_v7 }
 0x691   :  { %3709 = vmatprep.subr.bf16.mxu1 %v3708_v21  ;;  %2075 = vmatprep.mubr.f32.mxu0 %v5140_v36 }
 0x694   :  { %3711 = vmatpush3.bf16.msra.mxu1 %v3708_v21 }
 0x695   :  { %3760 = vmatprep.subr.bf16.mxu1 %v4232_v54 }
 0x697   :  { %3428 = vmatmul.mubr.msk.f32.vlgmr.msra.gmra.mrb[26].mxu1 %vm149_vm0, %v4800_v47 }
 0x75a   :  { %v4815_v51 = vpop.f32.mrb[16].mxu0 }
 0x75b   :  { %v4817_v23 = vpop.f32.mrb[17].mxu0 }
 0x762   :  { %v3418_v29 = vpop.f32.mrb[18].mxu0  ;;  %v4819_v13 = vpop.f32.mrb[24].mxu1 }
 0x763   :  { %v1776_v18 = vadd.f32 %v3418_v29, %v3111_v31  ;;  %v1770_v39 = vpop.f32.mrb[19].mxu0  ;;  %v4821_v52 = vpop.f32.mrb[25].mxu1 }
 0x764   :  { %v1771_v25 = vadd.f32 %v3111_v31, %v1770_v39 }
 0x765   :  { %v1880_v1 = vmul.f32 %v4372_v37, %v1776_v18  ;;  %v1904_v6 = vmul.f32 %v1776_v18, %v4462_v16  ;;  %v1910_v14 = vmul.f32 %v1776_v18, %v4518_v40  ;;  %v4827_v19 = vmul.f32 %v1776_v18, %v4552_v11 }
 0x766   :  { %1865 = vrot.lane.b32.xlu1 %v1771_v25, %s4233_s9  ;;  %v1879_v26 = vmul.f32 %v4372_v37, %v1771_v25  ;;  %v1903_v30 = vmul.f32 %v1771_v25, %v4462_v16  ;;  %v1909_v15 = vmul.f32 %v1771_v25, %v4518_v40  ;;  %v4834_v56 = vmul.f32 %v1771_v25, %v4552_v11 }
 0x767   :  { %v4837_v20 = vmul.f32 %v4434_v4, %v1771_v25  ;;  %v4840_v55 = vmul.f32 %v4434_v4, %v1776_v18  ;;  %v4843_v28 = vmul.f32 %v4579_v43, %v1771_v25  ;;  %v4846_v53 = vmul.f32 %v4579_v43, %v1776_v18 }
 0x768   :  { %v3713_v2 = vpack.c.bf16 %v1880_v1, %v1879_v26  ;;  %v3954_v32 = vpack.i.bf16 %v1904_v6, %v1903_v30  ;;  %v3959_v24 = vpack.i.bf16 %v1910_v14, %v1909_v15  ;;  %v3984_v41 = vpack.i.bf16 %v4827_v19, %v4834_v56 }
 0x769   :  { %v3725_v35 = vpack.c.bf16 %v4840_v55, %v4837_v20  ;;  %v3999_v63 = vpack.i.bf16 %v4846_v53, %v4843_v28  ;;  %v4855_v62 = vmul.f32 %v4441_v8, %v1771_v25  ;;  %v4858_v50 = vmul.f32 %v4441_v8, %v1776_v18 }
 0x76a   :  { %1867 = vrot.lane.b32.xlu1 %v1776_v18, %s4233_s9  ;;  %v3429_v33 = vpop.f32.mrb[26].mxu1  ;;  %3715 = vmatpush1.bf16.xpose.msk.msra.mxu0 %vm4481_vm11, %v3713_v2  ;;  %v4864_v48 = vmul.f32 %v4446_v9, %v1771_v25  ;;  %v4867_v0 = vmul.f32 %v4446_v9, %v1776_v18 }
 0x76b   :  { %v1860_v3 = vadd.f32 %v3429_v33, %v3114_v58  ;;  %v1854_v44 = vpop.f32.mrb[27].mxu1  ;;  %3716 = vmatprep.subr.bf16.mxu0 %v4232_v54  ;;  %v3737_v5 = vpack.c.bf16 %v4858_v50, %v4855_v62  ;;  %v3105_v62 = vld [vmem:[#allocation7 + $0x8] ss:$0 sm:$0xff] }
 0x76c   :  { %v1855_v10 = vadd.f32 %v3114_v58, %v1854_v44  ;;  %v1597_v50 = vadd.f32 %v3105_v62, %v4817_v23 }
 0x76d   :  { %v1884_v17 = vmul.f32 %v4372_v37, %v1860_v3  ;;  %v4876_v21 = vmul.f32 %v4434_v4, %v1860_v3  ;;  %v4879_v31 = vmul.f32 %v4441_v8, %v1860_v3  ;;  %v4882_v29 = vmul.f32 %v4446_v9, %v1860_v3 }
 0x76e   :  { %v1883_v18 = vmul.f32 %v4372_v37, %v1855_v10  ;;  %v4886_v39 = vmul.f32 %v4434_v4, %v1855_v10  ;;  %v4889_v25 = vmul.f32 %v4441_v8, %v1855_v10  ;;  %v4892_v1 = vmul.f32 %v4446_v9, %v1855_v10  ;;  %1873 = vrot.lane.b32.xlu1 %v1855_v10, %s4234_s10 }
 0x770   :  { %v3721_v6 = vpack.c.bf16 %v1884_v17, %v1883_v18  ;;  %v3733_v14 = vpack.c.bf16 %v4876_v21, %v4886_v39  ;;  %v3745_v26 = vpack.c.bf16 %v4879_v31, %v4889_v25 }
 0x772   :  { %1875 = vrot.lane.b32.xlu1 %v1860_v3, %s4234_s10 }
 0x776   :  { %3955 = vrot.lane.b32.xlu1 %v3954_v32, %s4231_s4 }
 0x77a   :  { %3960 = vrot.lane.b32.xlu1 %v3959_v24, %s4231_s4 }
 0x7d8   :  { %v4904_v15 = vpop.permute.xlu1 %1865 }
 0x7d9   :  { %v1881_v2 = vmul.f32 %v4372_v37, %v4904_v15  ;;  %v1905_v44 = vmul.f32 %v4904_v15, %v4462_v16  ;;  %v4918_v32 = vmul.f32 %v4446_v9, %v4904_v15  ;;  %v1911_v36 = vmul.f32 %v4904_v15, %v4518_v40 }
 0x7da   :  { %v1923_v55 = vmul.f32 %v4579_v43, %v4904_v15  ;;  %v1893_v28 = vmul.f32 %v4441_v8, %v4904_v15 }
 0x7dc   :  { %v4906_v58 = vpop.permute.xlu1 %1867 }
 0x7dd   :  { %v1882_v33 = vmul.f32 %v4372_v37, %v4906_v58  ;;  %v1906_v3 = vmul.f32 %v4906_v58, %v4462_v16  ;;  %v4922_v24 = vmul.f32 %v4446_v9, %v4906_v58  ;;  %v1912_v37 = vmul.f32 %v4906_v58, %v4518_v40 }
 0x7de   :  { %v1888_v56 = vmul.f32 %v4434_v4, %v4906_v58  ;;  %v1924_v20 = vmul.f32 %v4579_v43, %v4906_v58 }
 0x7df   :  { %v3717_v10 = vpack.c.bf16 %v1882_v33, %v1881_v2  ;;  %v3964_v17 = vpack.i.bf16 %v1906_v3, %v1905_v44  ;;  %v3753_v42 = vpack.c.bf16 %v4922_v24, %v4918_v32  ;;  %v3969_v2 = vpack.i.bf16 %v1912_v37, %v1911_v36 }
 0x7e0   :  { %v1874_v18 = vpop.permute.xlu1 %1873 }
 0x7e1   :  { %3719 = vmatpush1.bf16.xpose.msk.msra.mxu0 %vm4481_vm11, %v3717_v10  ;;  %3965 = vrot.lane.b32.xlu1 %v3964_v17, %s4231_s4  ;;  %v1907_v33 = vmul.f32 %v1874_v18, %v4462_v16  ;;  %v1913_v44 = vmul.f32 %v1874_v18, %v4518_v40 }
 0x7e2   :  { %3720 = vmatprep.subr.bf16.mxu0 %v4232_v54 }
 0x7e4   :  { %v1876_v9 = vpop.permute.xlu1 %1875 }
 0x7e5   :  { %v1908_v3 = vmul.f32 %v1876_v9, %v4462_v16  ;;  %v1914_v32 = vmul.f32 %v1876_v9, %v4518_v40  ;;  %3970 = vrot.lane.b32.xlu1 %v3969_v2, %s4231_s4  ;;  %v1918_v16 = vmul.f32 %v4906_v58, %v4552_v11  ;;  %v1917_v40 = vmul.f32 %v4904_v15, %v4552_v11 }
 0x7e6   :  { %v1919_v2 = vmul.f32 %v1874_v18, %v4552_v11 }
 0x7e7   :  { %v3979_v24 = vpack.i.bf16 %v1914_v32, %v1913_v44  ;;  %v3974_v10 = vpack.i.bf16 %v1908_v3, %v1907_v33  ;;  %v3989_v37 = vpack.i.bf16 %v1918_v16, %v1917_v40 }
 0x7e8   :  { %v3956_v17 = vpop.permute.xlu1 %3955 }
 0x7e9   :  { %v3958_v30 = vunpack.i.h.bf16 %v3956_v17  ;;  %v3957_v12 = vunpack.i.l.bf16 %v3956_v17  ;;  %3723 = vmatpush1.bf16.xpose.msk.msra.mxu0 %vm4481_vm11, %v3721_v6  ;;  %3980 = vrot.lane.b32.xlu0 %v3979_v24, %s4231_s4  ;;  %v1920_v6 = vmul.f32 %v1876_v9, %v4552_v11 }
 0x7ea   :  { %3975 = vrot.lane.b32.xlu1 %v3974_v10, %s4231_s4  ;;  %3724 = vmatprep.subr.bf16.mxu0 %v4232_v54 }
 0x7eb   :  { %v3761_v36 = vpack.c.bf16 %v3958_v30, %v3957_v12  ;;  %v3994_v19 = vpack.i.bf16 %v1920_v6, %v1919_v2  ;;  %v1925_v12 = vmul.f32 %v4579_v43, %v1874_v18 }
 0x7ec   :  { %v3961_v23 = vpop.permute.xlu1 %3960 }
 0x7ed   :  { %3985 = vrot.lane.b32.xlu0 %v3984_v41, %s4231_s4  ;;  %3762 = vmatpush1.bf16.msra.mxu1 %v3761_v36  ;;  %v1887_v41 = vmul.f32 %v4434_v4, %v4904_v15  ;;  %v4004_v4 = vpack.i.bf16 %v1924_v20, %v1923_v55  ;;  %v3962_v15 = vunpack.i.l.bf16 %v3961_v23 }
 0x7ee   :  { %3763 = vmatprep.subr.bf16.mxu1 %v4232_v54 }
 0x7ef   :  { %v3729_v11 = vpack.c.bf16 %v1888_v56, %v1887_v41 }
 0x7f1   :  { %3727 = vmatpush1.bf16.xpose.msk.msra.mxu0 %vm4481_vm11, %v3725_v35  ;;  %3990 = vrot.lane.b32.xlu0 %v3989_v37, %s4231_s4  ;;  %v1926_v35 = vmul.f32 %v4579_v43, %v1876_v9  ;;  %v1894_v43 = vmul.f32 %v4441_v8, %v4906_v58  ;;  %v5159_v8 = vpack.c.bf16 %v4882_v29, %v4892_v1 }
 0x7f2   :  { %3728 = vmatprep.subr.bf16.mxu0 %v4232_v54 }
 0x7f3   :  { %v4009_v30 = vpack.i.bf16 %v1926_v35, %v1925_v12  ;;  %v3741_v53 = vpack.c.bf16 %v1894_v43, %v1893_v28 }
 0x7f5   :  { %3995 = vrot.lane.b32.xlu0 %v3994_v19, %s4231_s4 }
 0x7f9   :  { %3731 = vmatpush1.bf16.xpose.msk.msra.mxu0 %vm4481_vm11, %v3729_v11  ;;  %4000 = vrot.lane.b32.xlu0 %v3999_v63, %s4231_s4  ;;  %v5158_v63 = vpack.c.bf16 %v4867_v0, %v4864_v48  ;;  %v5160_v48 = vmov 0.0   ;;  %v1602_v0 = vadd.f32 %v4815_v51, %v3105_v62 }
 0x7fa   :  { %3732 = vmatprep.subr.bf16.mxu0 %v4232_v54 }
 0x7fd   :  { %4005 = vrot.lane.b32.xlu0 %v4004_v4, %s4231_s4 }
 0x801   :  { %3735 = vmatpush1.bf16.xpose.msk.msra.mxu0 %vm4481_vm11, %v3733_v14  ;;  %4010 = vrot.lane.b32.xlu0 %v4009_v30, %s4231_s4 }
 0x802   :  { %3736 = vmatprep.subr.bf16.mxu0 %v4232_v54 }
 0x809   :  { %3739 = vmatpush1.bf16.xpose.msk.msra.mxu0 %vm4481_vm11, %v3737_v5  ;;  %v3108_v5 = vld [vmem:[#allocation7 + $0x9] ss:$0 sm:$0xff] }
 0x80a   :  { %3740 = vmatprep.subr.bf16.mxu0 %v4232_v54  ;;  %v1692_v22 = vadd.f32 %v4819_v13, %v3108_v5 }
 0x811   :  { %3743 = vmatpush1.bf16.xpose.msk.msra.mxu0 %vm4481_vm11, %v3741_v53 }
 0x812   :  { %3744 = vmatprep.subr.bf16.mxu0 %v4232_v54 }
 0x819   :  { %3747 = vmatpush1.bf16.xpose.msk.msra.mxu0 %vm4481_vm11, %v3745_v26  ;;  %v3963_v26 = vunpack.i.h.bf16 %v3961_v23 }
 0x81a   :  { %3748 = vmatprep.subr.bf16.mxu0 %v4232_v54 }
 0x81b   :  { %v3770_v13 = vpack.c.bf16 %v3963_v26, %v3962_v15 }
 0x821   :  { %3751 = vmatpush1.bf16.xpose.msk.msra.mxu0 %vm4481_vm11, %v5158_v63 }
 0x822   :  { %3752 = vmatprep.subr.bf16.mxu0 %v4232_v54 }
 0x829   :  { %3755 = vmatpush1.bf16.xpose.msk.msra.mxu0 %vm4481_vm11, %v3753_v42  ;;  %v1687_v42 = vadd.f32 %v3108_v5, %v4821_v52 }
 0x82a   :  { %3756 = vmatprep.subr.bf16.mxu0 %v4232_v54 }
 0x831   :  { %3759 = vmatpush1.bf16.xpose.msk.msra.mxu0 %vm4481_vm11, %v5159_v8 }
 0x838   :  { %3141 = vmatmul.mubr.msk.f32.vlgmr.msra.gmra.mrb[20].mxu0 %vm149_vm0, %v1597_v50 }
 0x839   :  { %2081 = vmatprep.mubr.f32.mxu0 %v5160_v48 }
 0x83c   :  { %3142 = vmatmul.mubr.msk.f32.gmra.mrb[22].mxu0 %vm149_vm0, %v1602_v0  ;;  %v4082_v0 = vld [vmem:[#allocation8 + $0x8] sm:$0xff] }
 0x83d   :  { %2087 = vmatprep.mubr.f32.mxu0 %v5160_v48 }
 0x840   :  { %3143 = vmatmul.mubr.msk.f32.gmra.mrb[24].mxu0 %vm149_vm0, %v1687_v42  ;;  %v4083_v42 = vld [vmem:[#allocation8] sm:$0xff] }
 0x841   :  { %2093 = vmatprep.mubr.f32.mxu0 %v5160_v48 }
 0x844   :  { %3144 = vmatmul.mubr.msk.f32.gmra.mrb[26].mxu0 %vm149_vm0, %v1692_v22 }
 0x853   :  { %v3966_v21 = vpop.permute.xlu1 %3965 }
 0x854   :  { %v3968_v31 = vunpack.i.h.bf16 %v3966_v21  ;;  %v3967_v29 = vunpack.i.l.bf16 %v3966_v21 }
 0x856   :  { %v3764_v51 = vpack.c.bf16 %v3968_v31, %v3967_v29 }
 0x857   :  { %v3971_v39 = vpop.permute.xlu1 %3970 }
 0x858   :  { %3765 = vmatpush1.bf16.msra.mxu1 %v3764_v51  ;;  %v3973_v9 = vunpack.i.h.bf16 %v3971_v39  ;;  %v3972_v33 = vunpack.i.l.bf16 %v3971_v39  ;;  %v4084_v51 = vld [vmem:[#allocation8 + $0x18] sm:$0xff] }
 0x859   :  { %3766 = vmatprep.subr.bf16.mxu1 %v4232_v54 }
 0x85a   :  { %v3773_v3 = vpack.c.bf16 %v3973_v9, %v3972_v33 }
 0x85b   :  { %v3981_v25 = vpop.permute.xlu0 %3980 }
 0x85c   :  { %v3976_v1 = vpop.permute.xlu1 %3975  ;;  %v3983_v32 = vunpack.i.h.bf16 %v3981_v25  ;;  %v3982_v24 = vunpack.i.l.bf16 %v3981_v25  ;;  %v4085_v25 = vld [vmem:[#allocation8 + $0x10] sm:$0xff] }
 0x85d   :  { %v3978_v52 = vunpack.i.h.bf16 %v3976_v1  ;;  %v3977_v14 = vunpack.i.l.bf16 %v3976_v1 }
 0x85e   :  { %v3776_v17 = vpack.c.bf16 %v3983_v32, %v3982_v24  ;;  %v4088_v24 = vld [vmem:[#allocation8 + $0x38] sm:$0xff] }
 0x85f   :  { %v3767_v58 = vpack.c.bf16 %v3978_v52, %v3977_v14  ;;  %v3986_v18 = vpop.permute.xlu0 %3985 }
 0x860   :  { %v3988_v36 = vunpack.i.h.bf16 %v3986_v18  ;;  %v3987_v16 = vunpack.i.l.bf16 %v3986_v18 }
 0x861   :  { %3768 = vmatpush1.bf16.msra.mxu1 %v3767_v58  ;;  %v4086_v58 = vld [vmem:[#allocation8 + $0x28] sm:$0xff] }
 0x862   :  { %3769 = vmatprep.subr.bf16.mxu1 %v4232_v54  ;;  %v3779_v40 = vpack.c.bf16 %v3988_v36, %v3987_v16 }
 0x863   :  { %v3991_v44 = vpop.permute.xlu0 %3990 }
 0x864   :  { %v3993_v6 = vunpack.i.h.bf16 %v3991_v44  ;;  %v3992_v37 = vunpack.i.l.bf16 %v3991_v44 }
 0x865   :  { %3771 = vmatpush1.bf16.msra.mxu1 %v3770_v13  ;;  %v4087_v13 = vld [vmem:[#allocation8 + $0x20] sm:$0xff] }
 0x866   :  { %3772 = vmatprep.subr.bf16.mxu1 %v4232_v54  ;;  %v3782_v19 = vpack.c.bf16 %v3993_v6, %v3992_v37 }
 0x867   :  { %v3996_v10 = vpop.permute.xlu0 %3995 }
 0x868   :  { %v3998_v56 = vunpack.i.h.bf16 %v3996_v10  ;;  %v3997_v41 = vunpack.i.l.bf16 %v3996_v10 }
 0x869   :  { %3774 = vmatpush1.bf16.msra.mxu1 %v3773_v3 }
 0x86a   :  { %3775 = vmatprep.subr.bf16.mxu1 %v4232_v54  ;;  %v3785_v20 = vpack.c.bf16 %v3998_v56, %v3997_v41 }
 0x86b   :  { %v4001_v2 = vpop.permute.xlu0 %4000 }
 0x86c   :  { %v4003_v55 = vunpack.i.h.bf16 %v4001_v2  ;;  %v4002_v35 = vunpack.i.l.bf16 %v4001_v2 }
 0x86d   :  { %3777 = vmatpush1.bf16.msra.mxu1 %v3776_v17  ;;  %v4089_v17 = vld [vmem:[#allocation8 + $0x30] sm:$0xff] }
 0x86e   :  { %3778 = vmatprep.subr.bf16.mxu1 %v4232_v54  ;;  %v3788_v4 = vpack.c.bf16 %v4003_v55, %v4002_v35 }
 0x86f   :  { %v4006_v11 = vpop.permute.xlu0 %4005 }
 0x870   :  { %v4008_v12 = vunpack.i.h.bf16 %v4006_v11  ;;  %v4007_v30 = vunpack.i.l.bf16 %v4006_v11 }
 0x871   :  { %3780 = vmatpush1.bf16.msra.mxu1 %v3779_v40 }
 0x872   :  { %3781 = vmatprep.subr.bf16.mxu1 %v4232_v54  ;;  %v3791_v28 = vpack.c.bf16 %v4008_v12, %v4007_v30 }
 0x873   :  { %v4011_v43 = vpop.permute.xlu0 %4010 }
 0x874   :  { %v4013_v53 = vunpack.i.h.bf16 %v4011_v43  ;;  %v4012_v63 = vunpack.i.l.bf16 %v4011_v43 }
 0x875   :  { %3783 = vmatpush1.bf16.msra.mxu1 %v3782_v19 }
 0x876   :  { %3784 = vmatprep.subr.bf16.mxu1 %v4232_v54  ;;  %v3794_v8 = vpack.c.bf16 %v4013_v53, %v4012_v63 }
 0x879   :  { %3786 = vmatpush1.bf16.msra.mxu1 %v3785_v20 }
 0x87a   :  { %3787 = vmatprep.subr.bf16.mxu1 %v4232_v54 }
 0x87d   :  { %3789 = vmatpush1.bf16.msra.mxu1 %v3788_v4 }
 0x87e   :  { %3790 = vmatprep.subr.bf16.mxu1 %v4232_v54 }
 0x881   :  { %3792 = vmatpush1.bf16.msra.mxu1 %v3791_v28 }
 0x882   :  { %3793 = vmatprep.subr.bf16.mxu1 %v4232_v54 }
 0x885   :  { %3795 = vmatpush1.bf16.msra.mxu1 %v3794_v8 }
 0x886   :  { %3796 = vmatprep.subr.bf16.mxu1 %v4232_v54 }
 0x90b   :  { %v2077_v62 = vpop.f32.mrb[20].mxu0 }
 0x90c   :  { %v2079_v50 = vpop.f32.mrb[21].mxu0  ;;  %v2078_v22 = vadd.f32 %v4083_v42, %v2077_v62 }
 0x90d   :  { %v2080_v5 = vadd.f32 %v4082_v0, %v2079_v50 }
 0x90f   :  { %v2083_v23 = vpop.f32.mrb[22].mxu0  ;;  %v2100_v21 = vsel %vm920_vm12, %v2080_v5, -inf }
 0x910   :  { %v2085_v31 = vpop.f32.mrb[23].mxu0  ;;  %v2101_v29 = vmax.f32 %v2078_v22, %v2100_v21  ;;  %v2084_v1 = vadd.f32 %v4085_v25, %v2083_v23  ;;  %v2573_v25 = vld [vmem:[#allocation5 + $0x1a8] sm:$0xff] }
 0x911   :  { %v2086_v39 = vadd.f32 %v4084_v51, %v2085_v31 }
 0x912   :  { %2102 = vmax.xlane.f32.xlu1 %v2101_v29 }
 0x913   :  { %v2089_v52 = vpop.f32.mrb[24].mxu0  ;;  %v2104_v14 = vsel %vm920_vm12, %v2086_v39, -inf }
 0x914   :  { %v2091_v26 = vpop.f32.mrb[25].mxu0  ;;  %v2105_v15 = vmax.f32 %v2084_v1, %v2104_v14  ;;  %v2090_v9 = vadd.f32 %v4087_v13, %v2089_v52  ;;  %v2473_v52 = vld [vmem:[#allocation5 + $0x198] sm:$0xff]  ;;  %v3840_v14 = vpack.c.bf16 %v2573_v25, %v2572_v60 }
 0x915   :  { %v2092_v18 = vadd.f32 %v4086_v58, %v2091_v26  ;;  %v2574_v26 = vld [vmem:[#allocation5 + $0x1b0] sm:$0xff] }
 0x916   :  { %2106 = vmax.xlane.f32.xlu0 %v2105_v15  ;;  %v2575_v15 = vld [vmem:[#allocation5 + $0x1b8] sm:$0xff] }
 0x917   :  { %v2095_v33 = vpop.f32.mrb[26].mxu0  ;;  %v2108_v44 = vsel %vm920_vm12, %v2092_v18, -inf  ;;  %v3844_v58 = vpack.c.bf16 %v2575_v15, %v2574_v26 }
 0x918   :  { %v2097_v3 = vpop.f32.mrb[27].mxu0  ;;  %v2109_v32 = vmax.f32 %v2090_v9, %v2108_v44  ;;  %v2096_v36 = vadd.f32 %v4089_v17, %v2095_v33 }
 0x919   :  { %v2098_v10 = vadd.f32 %v4088_v24, %v2097_v3 }
 0x91a   :  { %2110 = vmax.xlane.f32.xlu1 %v2109_v32 }
 0x91b   :  { %v2112_v16 = vsel %vm920_vm12, %v2098_v10, -inf }
 0x91c   :  { %v2113_v40 = vmax.f32 %v2096_v36, %v2112_v16 }
 0x91e   :  { %2114 = vmax.xlane.f32.xlu1 %v2113_v40 }
 0x99f   :  { %v2103_v6 = vpop.xlane.xlu1 %2102 }
 0x9a0   :  { %v2116_v37 = vsub.f32 %v2078_v22, %v2103_v6  ;;  %v2117_v2 = vsub.f32 %v2080_v5, %v2103_v6  ;;  %v5161_v22 = vmov 1.0|1.0  }
 0x9a2   :  { %v2124_v19 = vmul.f32 1.442695, %v2116_v37  ;;  %v2126_v56 = vmul.f32 1.442695, %v2117_v2 }
 0x9a3   :  { %v2107_v41 = vpop.xlane.xlu0 %2106 }
 0x9a4   :  { %4046 = vpow2.f32 %v2124_v19  ;;  %v2118_v11 = vsub.f32 %v2084_v1, %v2107_v41  ;;  %v2119_v20 = vsub.f32 %v2086_v39, %v2107_v41  ;;  %v3832_v39 = vpack.c.bf16 %v2471_v49, %v2470_v57  ;;  %v2472_v1 = vld [vmem:[#allocation5 + $0x190] sm:$0xff] }
 0x9a5   :  { %4048 = vpow2.f32 %v2126_v56  ;;  %v3836_v61 = vpack.c.bf16 %v2473_v52, %v2472_v1 }
 0x9a6   :  { %v2128_v55 = vmul.f32 1.442695, %v2118_v11  ;;  %v2130_v35 = vmul.f32 1.442695, %v2119_v20  ;;  %3833 = vmatprep.subr.bf16.mxu0 %v3832_v39 }
 0x9a7   :  { %v2111_v4 = vpop.xlane.xlu1 %2110  ;;  %3835 = vmatpush3.bf16.msra.mxu0 %v3832_v39 }
 0x9a8   :  { %4050 = vpow2.f32 %v2128_v55  ;;  %v2120_v12 = vsub.f32 %v2090_v9, %v2111_v4  ;;  %v2121_v30 = vsub.f32 %v2092_v18, %v2111_v4  ;;  %3837 = vmatprep.subr.bf16.mxu0 %v3836_v61 }
 0x9a9   :  { %4052 = vpow2.f32 %v2130_v35 }
 0x9aa   :  { %v2132_v43 = vmul.f32 1.442695, %v2120_v12  ;;  %v2134_v28 = vmul.f32 1.442695, %v2121_v30 }
 0x9ab   :  { %v2115_v53 = vpop.xlane.xlu1 %2114  ;;  %3839 = vmatpush3.bf16.msra.mxu0 %v3836_v61 }
 0x9ac   :  { %4054 = vpow2.f32 %v2132_v43  ;;  %v2122_v63 = vsub.f32 %v2096_v36, %v2115_v53  ;;  %v2123_v8 = vsub.f32 %v2098_v10, %v2115_v53 }
 0x9ad   :  { %4056 = vpow2.f32 %v2134_v28 }
 0x9ae   :  { %v4047_v62 = vpop.eup %4046  ;;  %v2136_v50 = vmul.f32 1.442695, %v2122_v63  ;;  %v2138_v0 = vmul.f32 1.442695, %v2123_v8 }
 0x9af   :  { %v4049_v5 = vpop.eup %4048 }
 0x9b0   :  { %4058 = vpow2.f32 %v2136_v50  ;;  %3145 = vmatprep.mubr.msk.f32.mxu1 %vm920_vm12, %v4049_v5 }
 0x9b1   :  { %4060 = vpow2.f32 %v2138_v0  ;;  %2313 = vmatmul.mubr.f32.vlgmr.msra.gmra.mrb[28].mxu1 %v4047_v62 }
 0x9b2   :  { %v4051_v42 = vpop.eup %4050  ;;  %3798 = vmatpush1.bf16.msk.msra.mxu1 %vm4684_vm13, %v5161_v22 }
 0x9b3   :  { %v4053_v23 = vpop.eup %4052  ;;  %3799 = vmatprep.subr.bf16.mxu1 %v4232_v54 }
 0x9b4   :  { %3146 = vmatprep.mubr.msk.f32.mxu1 %vm920_vm12, %v4053_v23 }
 0x9b5   :  { %2318 = vmatmul.mubr.f32.gmra.mrb[30].mxu1 %v4051_v42 }
 0x9b6   :  { %v4055_v21 = vpop.eup %4054  ;;  %3801 = vmatpush1.bf16.msk.msra.mxu1 %vm4684_vm13, %v5161_v22 }
 0x9b7   :  { %v4057_v31 = vpop.eup %4056  ;;  %3802 = vmatprep.subr.bf16.mxu1 %v4232_v54 }
 0x9b8   :  { %3147 = vmatprep.mubr.msk.f32.mxu1 %vm920_vm12, %v4057_v31 }
 0x9b9   :  { %2323 = vmatmul.mubr.f32.gmra.mrb[32].mxu1 %v4055_v21 }
 0x9ba   :  { %v4059_v29 = vpop.eup %4058  ;;  %3804 = vmatpush1.bf16.msk.msra.mxu1 %vm4684_vm13, %v5161_v22 }
 0x9bb   :  { %v4061_v51 = vpop.eup %4060  ;;  %3805 = vmatprep.subr.bf16.mxu1 %v4232_v54 }
 0x9bc   :  { %3148 = vmatprep.mubr.msk.f32.mxu1 %vm920_vm12, %v4061_v51 }
 0x9bd   :  { %2328 = vmatmul.mubr.f32.gmra.mrb[34].mxu1 %v4059_v29 }
 0x9be   :  { %3807 = vmatpush1.bf16.msk.msra.mxu1 %vm4706_vm14, %v5161_v22  ;;  %3173 = vmatprep.mubr.msk.f32.mxu1 %vm920_vm12, %v4049_v5 }
 0x9bf   :  { %3808 = vmatprep.subr.bf16.mxu1 %v4232_v54 }
 0x9c2   :  { %3810 = vmatpush1.bf16.msk.msra.mxu1 %vm4706_vm14, %v5161_v22 }
 0x9c3   :  { %3811 = vmatprep.subr.bf16.mxu1 %v4232_v54 }
 0x9c6   :  { %3813 = vmatpush1.bf16.msk.msra.mxu1 %vm4706_vm14, %v5161_v22 }
 0x9c7   :  { %3814 = vmatprep.subr.bf16.mxu1 %v4232_v54 }
 0x9ca   :  { %3816 = vmatpush1.bf16.msk.msra.mxu1 %vm4727_vm15, %v5161_v22 }
 0x9cb   :  { %3817 = vmatprep.subr.bf16.mxu1 %v4232_v54 }
 0x9ce   :  { %3819 = vmatpush1.bf16.msk.msra.mxu1 %vm4727_vm15, %v5161_v22 }
 0x9cf   :  { %3820 = vmatprep.subr.bf16.mxu1 %v4232_v54 }
 0x9d2   :  { %3822 = vmatpush1.bf16.msk.msra.mxu1 %vm4727_vm15, %v5161_v22 }
 0x9d3   :  { %3823 = vmatprep.subr.bf16.mxu1 %v4232_v54 }
 0x9d6   :  { %3825 = vmatpush1.bf16.msk.msra.mxu1 %vm4746_vm1, %v5161_v22 }
 0x9d7   :  { %3826 = vmatprep.subr.bf16.mxu1 %v4232_v54 }
 0x9da   :  { %3828 = vmatpush1.bf16.msk.msra.mxu1 %vm4746_vm1, %v5161_v22 }
 0x9db   :  { %3829 = vmatprep.subr.bf16.mxu1 %v4232_v54 }
 0x9de   :  { %3831 = vmatpush1.bf16.msk.msra.mxu1 %vm4746_vm1, %v5161_v22 }
 0x9df   :  { %3841 = vmatprep.subr.bf16.mxu1 %v3840_v14 }
 0x9e1   :  { %2398 = vmatmul.mubr.f32.vlgmr.msra.gmra.mrb[36].mxu1 %v4047_v62 }
 0x9e2   :  { %3174 = vmatprep.mubr.msk.f32.mxu1 %vm920_vm12, %v4053_v23  ;;  %3843 = vmatpush3.bf16.msra.mxu1 %v3840_v14 }
 0x9e3   :  { %3845 = vmatprep.subr.bf16.mxu1 %v3844_v58 }
 0x9e5   :  { %2403 = vmatmul.mubr.f32.gmra.mrb[38].mxu1 %v4051_v42 }
 0x9e6   :  { %3175 = vmatprep.mubr.msk.f32.mxu1 %vm920_vm12, %v4057_v31  ;;  %3847 = vmatpush3.bf16.msra.mxu1 %v3844_v58 }
 0x9e7   :  { %3856 = vmatprep.subr.bf16.mxu1 %v4232_v54 }
 0x9e9   :  { %2408 = vmatmul.mubr.f32.gmra.mrb[40].mxu1 %v4055_v21 }
 0x9ea   :  { %3176 = vmatprep.mubr.msk.f32.mxu1 %vm920_vm12, %v4061_v51 }
 0x9ed   :  { %2413 = vmatmul.mubr.f32.gmra.mrb[42].mxu1 %v4059_v29 }
 0xa84   :  { %v2314_v18 = vpop.f32.mrb[28].mxu1 }
 0xa85   :  { %v2316_v13 = vpop.f32.mrb[29].mxu1 }
 0xa88   :  { %v2319_v9 = vpop.f32.mrb[30].mxu1 }
 0xa89   :  { %v2321_v33 = vpop.f32.mrb[31].mxu1 }
 0xa8c   :  { %v2324_v44 = vpop.f32.mrb[32].mxu1 }
 0xa8d   :  { %v2326_v3 = vpop.f32.mrb[33].mxu1 }
 0xa90   :  { %v2329_v32 = vpop.f32.mrb[34].mxu1 }
 0xa91   :  { %v2331_v24 = vpop.f32.mrb[35].mxu1 }
 0xab4   :  { %v2399_v10 = vpop.f32.mrb[36].mxu1 }
 0xab5   :  { %v2418_v17 = vmax.f32 %v2399_v10, 1e-30  ;;  %v2401_v36 = vpop.f32.mrb[37].mxu1 }
 0xab6   :  { %v2674_v36 = vld [vmem:[#allocation10] sm:$0xff] }
 0xab7   :  { %4062 = vrcp.f32 %v2418_v17 }
 0xab8   :  { %v2404_v16 = vpop.f32.mrb[38].mxu1 }
 0xab9   :  { %v2419_v40 = vmax.f32 %v2404_v16, 1e-30  ;;  %v2406_v6 = vpop.f32.mrb[39].mxu1  ;;  %v2761_v16 = vld [vmem:[#allocation5 + $0x1e0] sm:$0xff] }
 0xabb   :  { %4064 = vrcp.f32 %v2419_v40  ;;  %v2762_v40 = vld [vmem:[#allocation5 + $0x1e8] sm:$0xff] }
 0xabc   :  { %v2409_v37 = vpop.f32.mrb[40].mxu1  ;;  %v3857_v6 = vpack.c.bf16 %v2762_v40, %v2761_v16 }
 0xabd   :  { %v2420_v2 = vmax.f32 %v2409_v37, 1e-30  ;;  %v2411_v19 = vpop.f32.mrb[41].mxu1  ;;  %v2763_v37 = vld [vmem:[#allocation5 + $0x1f0] sm:$0xff] }
 0xabf   :  { %4066 = vrcp.f32 %v2420_v2  ;;  %v2764_v2 = vld [vmem:[#allocation5 + $0x1f8] sm:$0xff] }
 0xac0   :  { %v2414_v56 = vpop.f32.mrb[42].mxu1  ;;  %v3860_v19 = vpack.c.bf16 %v2764_v2, %v2763_v37 }
 0xac1   :  { %v4063_v41 = vpop.eup %4062  ;;  %v2421_v11 = vmax.f32 %v2414_v56, 1e-30  ;;  %v2416_v20 = vpop.f32.mrb[43].mxu1  ;;  %v3177_v56 = vld [vmem:[#allocation7 + $0xc] ss:$0 sm:$0xff] }
 0xac2   :  { %v2426_v55 = vmul.f32 %v4063_v41, %v2314_v18  ;;  %v2565_v20 = vstv %s2564_s20 }
 0xac3   :  { %4068 = vrcp.f32 %v2421_v11  ;;  %v2561_v11 = vstv %s3180_s19 }
 0xac4   :  { %v2430_v35 = vmul.f32 %v2426_v55, %v4764_v59 }
 0xac5   :  { %v4065_v4 = vpop.eup %4064 }
 0xac6   :  { %v2427_v12 = vmul.f32 %v4065_v4, %v2319_v9  ;;  %v2434_v30 = vmul.f32 %v2430_v35, %v2430_v35 }
 0xac8   :  { %v2431_v43 = vmul.f32 %v2427_v12, %v4767_v34  ;;  %v2438_v28 = vmul.f32 %v2434_v30, %v2430_v35  ;;  %v2567_v30 = vmul.f32 %v2565_v20, %v4788_v45 }
 0xac9   :  { %v4067_v53 = vpop.eup %4066 }
 0xaca   :  { %v2435_v63 = vmul.f32 %v2431_v43, %v2431_v43  ;;  %v2428_v8 = vmul.f32 %v4067_v53, %v2324_v44  ;;  %v2442_v62 = vmul.f32 0.044715, %v2438_v28  ;;  %v2566_v28 = vmul.f32 %v2565_v20, %v4785_v38 }
 0xacc   :  { %v2439_v50 = vmul.f32 %v2435_v63, %v2431_v43  ;;  %v2432_v0 = vmul.f32 %v2428_v8, %v4770_v46  ;;  %v2446_v5 = vadd.f32 %v2442_v62, %v2430_v35  ;;  %v3181_v8 = vld [vmem:[#allocation7 + $0xd] ss:$0 sm:$0xff] }
 0xacd   :  { %v4069_v42 = vpop.eup %4068 }
 0xace   :  { %v2443_v22 = vmul.f32 0.044715, %v2439_v50  ;;  %v2429_v23 = vmul.f32 %v4069_v42, %v2329_v32  ;;  %v2450_v21 = vmul.f32 0.7978846, %v2446_v5  ;;  %v2436_v31 = vmul.f32 %v2432_v0, %v2432_v0 }
 0xacf   :  { %v2663_v5 = vstv %s3184_s1  ;;  %v2667_v42 = vstv %s2666_s21 }
 0xad0   :  { %v2447_v59 = vadd.f32 %v2443_v22, %v2431_v43  ;;  %v2433_v29 = vmul.f32 %v2429_v23, %v4773_v27  ;;  %4070 = vtanh.f32 %v2450_v21  ;;  %v2440_v51 = vmul.f32 %v2436_v31, %v2432_v0 }
 0xad2   :  { %v2451_v34 = vmul.f32 0.7978846, %v2447_v59  ;;  %v2437_v57 = vmul.f32 %v2433_v29, %v2433_v29  ;;  %v2444_v49 = vmul.f32 0.044715, %v2440_v51  ;;  %v2668_v51 = vmul.f32 %v2667_v42, %v4798_v7 }
 0xad4   :  { %v2441_v60 = vmul.f32 %v2437_v57, %v2433_v29  ;;  %4072 = vtanh.f32 %v2451_v34  ;;  %v2448_v39 = vadd.f32 %v2444_v49, %v2432_v0 }
 0xad6   :  { %v2445_v25 = vmul.f32 0.044715, %v2441_v60  ;;  %v2452_v1 = vmul.f32 0.7978846, %v2448_v39  ;;  %v2757_v39 = vld [vmem:[#allocation5 + $0x1c0] sm:$0xff] }
 0xad8   :  { %v2449_v46 = vadd.f32 %v2445_v25, %v2433_v29  ;;  %4074 = vtanh.f32 %v2452_v1  ;;  %v2758_v25 = vld [vmem:[#allocation5 + $0x1c8] sm:$0xff]  ;;  %v2675_v1 = vld [vmem:[#allocation10 + $0x8] sm:$0xff] }
 0xada   :  { %v4071_v52 = vpop.eup %4070  ;;  %v2453_v14 = vmul.f32 0.7978846, %v2449_v46  ;;  %v3863_v46 = vpack.c.bf16 %v2758_v25, %v2757_v39 }
 0xadb   :  { %v2458_v61 = vadd.f32 1.0, %v4071_v52  ;;  %v2759_v52 = vld [vmem:[#allocation5 + $0x1d0] sm:$0xff] }
 0xadc   :  { %4076 = vtanh.f32 %v2453_v14 }
 0xadd   :  { %v2462_v26 = vmul.f32 0.5, %v2458_v61 }
 0xade   :  { %v4073_v15 = vpop.eup %4072 }
 0xadf   :  { %v2466_v58 = vmul.f32 %v2462_v26, %v2430_v35  ;;  %v2459_v27 = vadd.f32 1.0, %v4073_v15  ;;  %v2918_v26 = vld [vmem:[#allocation5 + $0x200] sm:$0xff]  ;;  %v2919_v15 = vld [vmem:[#allocation5 + $0x208] sm:$0xff] }
 0xae1   :  { %3438 = vmatprep.mubr.msk.f32.mxu0 %vm149_vm0, %v2466_v58  ;;  %v2463_v18 = vmul.f32 0.5, %v2459_v27  ;;  %v3869_v58 = vpack.c.bf16 %v2919_v15, %v2918_v26  ;;  %v2920_v27 = vld [vmem:[#allocation5 + $0x210] sm:$0xff] }
 0xae2   :  { %v4075_v13 = vpop.eup %4074 }
 0xae3   :  { %v2467_v9 = vmul.f32 %v2463_v18, %v2431_v43  ;;  %v2460_v33 = vadd.f32 1.0, %v4075_v13  ;;  %v2921_v18 = vld [vmem:[#allocation5 + $0x218] sm:$0xff] }
 0xae4   :  { %v3872_v13 = vpack.c.bf16 %v2921_v18, %v2920_v27 }
 0xae5   :  { %3439 = vmatmul.mubr.msk.f32.vlgmr.msra.gmra.mrb[28].mxu0 %vm149_vm0, %v2467_v9  ;;  %v2464_v44 = vmul.f32 0.5, %v2460_v33 }
 0xae6   :  { %v4077_v3 = vpop.eup %4076  ;;  %3460 = vmatprep.mubr.msk.f32.mxu0 %vm149_vm0, %v2674_v36 }
 0xae7   :  { %v2468_v32 = vmul.f32 %v2464_v44, %v2432_v0  ;;  %v2461_v24 = vadd.f32 1.0, %v4077_v3  ;;  %v3189_v3 = vld [vmem:[#allocation7 + $0xe] ss:$0 sm:$0xff] }
 0xae9   :  { %3449 = vmatprep.mubr.msk.f32.mxu1 %vm149_vm0, %v2468_v32  ;;  %v2465_v10 = vmul.f32 0.5, %v2461_v24 }
 0xaeb   :  { %v2469_v17 = vmul.f32 %v2465_v10, %v2433_v29  ;;  %v2669_v29 = vmul.f32 %v2667_v42, %v4800_v47  ;;  %v2760_v47 = vld [vmem:[#allocation5 + $0x1d8] sm:$0xff] }
 0xaec   :  { %v3866_v7 = vpack.c.bf16 %v2760_v47, %v2759_v52 }
 0xaed   :  { %3450 = vmatmul.mubr.msk.f32.vlgmr.msra.gmra.mrb[44].mxu1 %vm149_vm0, %v2469_v17 }
 0xaee   :  { %3858 = vmatpush3.bf16.msra.mxu1 %v3857_v6  ;;  %3471 = vmatprep.mubr.msk.f32.mxu1 %vm4237_vm2, %v5160_v48 }
 0xaef   :  { %3859 = vmatprep.subr.bf16.mxu1 %v4232_v54 }
 0xaf2   :  { %3861 = vmatpush3.bf16.msra.mxu1 %v3860_v19 }
 0xaf3   :  { %3868 = vmatprep.subr.bf16.mxu1 %v4232_v54 }
 0xbb8   :  { %v3440_v41 = vpop.f32.mrb[28].mxu0 }
 0xbb9   :  { %v2557_v55 = vadd.f32 %v3440_v41, %v3177_v56  ;;  %v2551_v35 = vpop.f32.mrb[29].mxu0 }
 0xbba   :  { %v2552_v4 = vadd.f32 %v3177_v56, %v2551_v35 }
 0xbbb   :  { %v2563_v12 = vmul.f32 %v2561_v11, %v2557_v55 }
 0xbbc   :  { %v2562_v43 = vmul.f32 %v2561_v11, %v2552_v4 }
 0xbbd   :  { %v2569_v53 = vadd.f32 %v2567_v30, %v2563_v12 }
 0xbbe   :  { %v2568_v63 = vadd.f32 %v2566_v28, %v2562_v43 }
 0xbbf   :  { %v2571_v62 = vmax.f32 %v2569_v53, 0.0 }
 0xbc0   :  { %v2570_v50 = vmax.f32 %v2568_v63, 0.0  ;;  %v3451_v0 = vpop.f32.mrb[44].mxu1 }
 0xbc1   :  { %v2659_v22 = vadd.f32 %v3451_v0, %v3181_v8  ;;  %v2653_v23 = vpop.f32.mrb[45].mxu1 }
 0xbc2   :  { %v2654_v21 = vadd.f32 %v3181_v8, %v2653_v23  ;;  %v3848_v31 = vpack.c.bf16 %v2571_v62, %v2570_v50 }
 0xbc3   :  { %v2665_v59 = vmul.f32 %v2663_v5, %v2659_v22 }
 0xbc4   :  { %v2664_v45 = vmul.f32 %v2663_v5, %v2654_v21  ;;  %3849 = vmatprep.subr.bf16.mxu0 %v3848_v31 }
 0xbc5   :  { %v2671_v38 = vadd.f32 %v2669_v29, %v2665_v59  ;;  %3851 = vmatpush3.bf16.msra.mxu0 %v3848_v31 }
 0xbc6   :  { %v2670_v34 = vadd.f32 %v2668_v51, %v2664_v45 }
 0xbc7   :  { %v2673_v57 = vmax.f32 %v2671_v38, 0.0 }
 0xbc8   :  { %v2672_v49 = vmax.f32 %v2670_v34, 0.0 }
 0xbca   :  { %v3852_v60 = vpack.c.bf16 %v2673_v57, %v2672_v49 }
 0xbcc   :  { %3853 = vmatprep.subr.bf16.mxu0 %v3852_v60 }
 0xbcd   :  { %3855 = vmatpush3.bf16.msra.mxu0 %v3852_v60 }
 0xbce   :  { %3862 = vmatprep.subr.bf16.mxu0 %v4232_v54 }
 0xbd0   :  { %3461 = vmatmul.mubr.msk.f32.vlgmr.msra.gmra.mrb[30].mxu0 %vm149_vm0, %v2675_v1 }
 0xbd1   :  { %3864 = vmatpush3.bf16.msra.mxu0 %v3863_v46  ;;  %3482 = vmatprep.mubr.msk.f32.mxu0 %vm4237_vm2, %v5160_v48 }
 0xbd2   :  { %3865 = vmatprep.subr.bf16.mxu0 %v4232_v54 }
 0xbd5   :  { %3867 = vmatpush3.bf16.msra.mxu0 %v3866_v7 }
 0xca3   :  { %v3462_v14 = vpop.f32.mrb[30].mxu0 }
 0xca4   :  { %v2748_v61 = vpop.f32.mrb[31].mxu0  ;;  %3472 = vmatmul.mubr.msk.f32.vlgmr.msra.gmra.mrb[46].mxu1 %vm149_vm0, %v3462_v14 }
 0xca5   :  { %3483 = vmatmul.mubr.msk.f32.vlgmr.msra.gmra.mrb[32].mxu0 %vm149_vm0, %v2748_v61  ;;  %3493 = vmatprep.mubr.msk.f32.mxu1 %vm4237_vm2, %v5160_v48  ;;  %v3190_v48 = vld [vmem:[#allocation7 + $0xf] ss:$0 sm:$0xff] }
 0xca6   :  { %3870 = vmatpush3.bf16.msra.mxu1 %v3869_v58 }
 0xca7   :  { %3871 = vmatprep.subr.bf16.mxu1 %v4232_v54 }
 0xcaa   :  { %3873 = vmatpush3.bf16.msra.mxu1 %v3872_v13 }
 0xd77   :  { %v2834_v9 = vpop.f32.mrb[46].mxu1 }
 0xd78   :  { %v3473_v33 = vpop.f32.mrb[47].mxu1  ;;  %v2907_v44 = vpop.f32.mrb[32].mxu0 }
 0xd79   :  { %v2908_v32 = vadd.f32 %v2907_v44, %v2834_v9  ;;  %v3484_v24 = vpop.f32.mrb[33].mxu0 }
 0xd7b   :  { %v2916_v10 = vadd.f32 %v3189_v3, %v2908_v32 }
 0xd7d   :  { %v2917_v17 = vmax.f32 %v2916_v10, 0.0 }
 0xd7f   :  { %3494 = vmatmul.mubr.msk.f32.vlgmr.msra.gmra.mrb[48].mxu1 %vm149_vm0, %v2917_v17 }
 0xe52   :  { %v2996_v36 = vpop.f32.mrb[48].mxu1 }
 0xe53   :  { %v2997_v16 = vadd.f32 %v3190_v48, %v2996_v36  ;;  %v3495_v40 = vpop.f32.mrb[49].mxu1 }
 0xe55   :  { %v3192_v6 = vmul.f32 -1.442695, %v2997_v16 }
 0xe57   :  { %4078 = vpow2.f32 %v3192_v6 }
 0xe61   :  { %v4079_v54 = vpop.eup %4078 }
 0xe62   :  { %v3003_v37 = vadd.f32 1.0, %v4079_v54 }
 0xe64   :  { %4080 = vrcp.f32 %v3003_v37 }
 0xe6e   :  { %v4081_v2 = vpop.eup %4080 }
 0xe6f   :  { %3007 = vst.msk [vmem:[%s5137_s6] sm:$0xf] %vm3006_vm3, %v4081_v2 }
 0xe70   :  { %3012 = vsyncpa [#allocation3], 1 }
 0xe71   :  { %3013 = vsyncpa [#allocation6], 1 }
 0xe72   :  { %3014 = vsyncpa [#allocation9], 1 }
 0xe73   :  { %3015 = vsyncpa [#allocation4], 1 }

</bundles_post_ra>
